<compile_context>
chip_gen: v5e
topology: v5e:2x2
jax: 0.10.0
libtpu: 0.0.40
codegen_flags: <defaults>
</compile_context>

<pallas_src>
import functools
import math

import jax
import jax.numpy as jnp
from jax.experimental import pallas as pl
from jax.experimental.pallas import tpu as pltpu

LANE = 128
BF16_SUBLANE = 16  # bf16 packs 16 rows per vreg -> batch-tile granularity


def _round_up(n, m):
    return ((n + m - 1) // m) * m


# --------------------------------------------------------------------------- kernel
def sinenet_kernel(x_ref, w1_ref, b1_ref, w2_ref, b2_ref, w3_ref, b3_ref, o_ref,
                   *, bf16_epilogue=False):
    # One (tile_n, D_in_p) batch tile; padded weights/biases are VMEM-resident
    # (single-buffered, fetched once).  bf16 MXU inputs, f32 accumulate; bias+sin
    # epilogue in f32 (or bf16 on the hidden layers when bf16_epilogue=True).
    hdt = jnp.bfloat16 if bf16_epilogue else jnp.float32

    x = x_ref[...].astype(jnp.bfloat16)

    z1 = jnp.dot(x, w1_ref[...], preferred_element_type=jnp.float32) + b1_ref[...]
    h1 = jnp.sin(z1.astype(hdt))

    z2 = jnp.dot(h1.astype(jnp.bfloat16), w2_ref[...],
                 preferred_element_type=jnp.float32) + b2_ref[...]
    h2 = jnp.sin(z2.astype(hdt))

    z3 = jnp.dot(h2.astype(jnp.bfloat16), w3_ref[...],
                 preferred_element_type=jnp.float32) + b3_ref[...]
    h3 = jnp.sin(z3)  # final layer always f32

    o_ref[...] = h3.astype(o_ref.dtype)


# ------------------------------------------------------------------------ parameters
def init_sinenet_params(key, D_in, H, D_out):
    """Logical params mimicking torch.nn.Linear default init
    (U[-1/sqrt(fan_in), 1/sqrt(fan_in)]).  Weights stored transposed to (in, out),
    biases as (1, out) rows."""
    ks = jax.random.split(key, 6)

    def lin(kw, kb, fan_in, fan_out):
        bound = 1.0 / math.sqrt(fan_in)
        w = jax.random.uniform(kw, (fan_in, fan_out), jnp.float32, -bound, bound)
        b = jax.random.uniform(kb, (1, fan_out), jnp.float32, -bound, bound)
        return w, b

    w1, b1 = lin(ks[0], ks[1], D_in, H)
    w2, b2 = lin(ks[2], ks[3], H, H)
    w3, b3 = lin(ks[4], ks[5], H, D_out)
    return {"w1": w1, "b1": b1, "w2": w2, "b2": b2, "w3": w3, "b3": b3}


def prepare_params(params):
    """Pad feature dims up to multiples of 128 and cast weights to bf16
    (biases stay f32).  Done once, outside the hot path."""
    w1, b1 = params["w1"], params["b1"]
    w2, b2 = params["w2"], params["b2"]
    w3, b3 = params["w3"], params["b3"]
    D_in, H = w1.shape
    D_out = w3.shape[1]
    D_in_p = _round_up(D_in, LANE)
    H_p = _round_up(H, LANE)
    D_out_p = _round_up(D_out, LANE)

    def pad2(a, rows, cols):
        return jnp.pad(a, ((0, rows - a.shape[0]), (0, cols - a.shape[1])))

    return {
        "w1": pad2(w1, D_in_p, H_p).astype(jnp.bfloat16),
        "b1": pad2(b1, 1, H_p),
        "w2": pad2(w2, H_p, H_p).astype(jnp.bfloat16),
        "b2": pad2(b2, 1, H_p),
        "w3": pad2(w3, H_p, D_out_p).astype(jnp.bfloat16),
        "b3": pad2(b3, 1, D_out_p),
        "d_in": D_in,
        "d_out": D_out,
    }


# ---------------------------------------------------------------------- sizing logic
def _vmem_budget():
    """(physical_vmem_bytes, usable_cap_bytes) -- generation aware."""
    try:
        phys = int(pltpu.get_tpu_info().vmem_capacity_bytes)
    except Exception:
        phys = 64 * 1024 * 1024  # conservative (v7x-sized) fallback
    if phys >= 96 * 1024 * 1024:          # v5e / v6e: 128 MiB physical
        cap = phys - 24 * 1024 * 1024     # ~104 MiB usable
    else:                                 # v7x: 64 MiB per TC
        cap = phys - 8 * 1024 * 1024      # ~56 MiB, leave compiler headroom
    return phys, max(cap, 16 * 1024 * 1024)


def _pick_tile_n(N, D_in_p, H_p, D_out_p, in_itemsize, resident_bytes, vmem_cap):
    # Per-batch-row VMEM cost inside the kernel:
    #   double-buffered x/out tiles + ~3 f32 hidden activations.
    per_row = 2 * (D_in_p * in_itemsize + D_out_p * 4) + 3 * H_p * 4
    budget = max((vmem_cap - 2 * resident_bytes) // 2, BF16_SUBLANE * per_row)
    max_rows = max(BF16_SUBLANE, budget // per_row)

    n_up = _round_up(N, BF16_SUBLANE)
    if n_up <= 256:
        return max(BF16_SUBLANE,
                   min(n_up, (max_rows // BF16_SUBLANE) * BF16_SUBLANE))

    # Large N: MXU-M-aligned (256) tiles, capped by the VMEM budget, and keep
    # >=2 tiles so the "parallel" batch axis can feed both v7x TensorCores.
    tile = max(256, min(1024, (max_rows // 256) * 256))
    while tile > 256 and _round_up(N, tile) // tile < 2:
        tile -= 256
    return tile


# --------------------------------------------------------------------------- forward
def sinenet_forward(x, prep, *, tile_n=None, bf16_epilogue=False):
    """x: (N, D_in) float32.  prep: output of prepare_params."""
    w1, b1 = prep["w1"], prep["b1"]
    w2, b2 = prep["w2"], prep["b2"]
    w3, b3 = prep["w3"], prep["b3"]
    D_in, D_out = prep["d_in"], prep["d_out"]
    D_in_p, H_p = w1.shape
    D_out_p = w3.shape[1]
    N = x.shape[0]

    resident_bytes = sum(a.size * a.dtype.itemsize for a in (w1, b1, w2, b2, w3, b3))
    _, vmem_cap = _vmem_budget()

    if resident_bytes > (vmem_cap * 3) // 4:
        # TODO(synk): for very large H, block the hidden dim (K/N grid axis + f32
        # accumulator scratch) instead of whole-weight VMEM residency.
        raise NotImplementedError(
            f"resident weights ({resident_bytes} B) exceed VMEM budget ({vmem_cap} B)")

    needs_in_pad = D_in != D_in_p
    if tile_n is None:
        in_itemsize = 2 if needs_in_pad else x.dtype.itemsize
        tile_n = _pick_tile_n(N, D_in_p, H_p, D_out_p, in_itemsize,
                              resident_bytes, vmem_cap)
    N_p = _round_up(N, tile_n)

    if needs_in_pad or N_p != N:
        # Single fused pad+cast pass (only when layout actually requires it).
        x_in = jnp.zeros((N_p, D_in_p), jnp.bfloat16).at[:N, :D_in].set(
            x.astype(jnp.bfloat16))
    else:
        x_in = x  # no wrapper-side HBM pass; kernel casts each tile to bf16

    grid = (N_p // tile_n,)

    def resident(a):
        # Constant index_map -> fetched once; Buffered(1) drops the useless second
        # VMEM buffer (halves resident-weight footprint, w2 dominant).
        return pl.BlockSpec(a.shape, lambda i: (0,) * a.ndim,
                            pipeline_mode=pl.Buffered(1))

    # Explicit VMEM budget: single-buffered resident weights + double-buffered
    # x/out tiles + in-body f32 activations, with ~1.5x headroom for Mosaic scratch.
    in_itemsize = x_in.dtype.itemsize
    tile_bytes = 2 * tile_n * (D_in_p * in_itemsize + D_out_p * 4)
    act_bytes = 3 * tile_n * H_p * 4
    vmem_limit = int(min(vmem_cap,
                         max(16 * 1024 * 1024,
                             (3 * (resident_bytes + tile_bytes + act_bytes)) // 2)))

    # Advisory cost estimate (padded shapes).
    flops = 2 * N_p * (D_in_p * H_p + H_p * H_p + H_p * D_out_p)
    transcendentals = N_p * (2 * H_p + D_out_p)
    bytes_accessed = (x_in.size * x_in.dtype.itemsize
                      + resident_bytes
                      + N_p * D_out_p * 4)

    out_p = pl.pallas_call(
        functools.partial(sinenet_kernel, bf16_epilogue=bf16_epilogue),
        out_shape=jax.ShapeDtypeStruct((N_p, D_out_p), jnp.float32),
        grid=grid,
        in_specs=[
            pl.BlockSpec((tile_n, D_in_p), lambda i: (i, 0)),  # default 2-deep pipeline
            resident(w1), resident(b1),
            resident(w2), resident(b2),
            resident(w3), resident(b3),
        ],
        out_specs=pl.BlockSpec((tile_n, D_out_p), lambda i: (i, 0)),
        compiler_params=pltpu.CompilerParams(
            dimension_semantics=("parallel",),
            vmem_limit_bytes=vmem_limit,
        ),
        cost_estimate=pl.CostEstimate(
            flops=int(flops),
            transcendentals=int(transcendentals),
            bytes_accessed=int(bytes_accessed),
        ),
    )(x_in, w1, b1, w2, b2, w3, b3)

    if N_p != N or D_out_p != D_out:
        out_p = out_p[:N, :D_out]
    return out_p


# ------------------------------------------------------------------------- reference
def sinenet_reference(x, p):
    """Pure-JAX reference mirroring the kernel numerics
    (bf16 matmul inputs, f32 accumulation / bias / sin)."""

    def layer(h, w, b):
        h16 = h.astype(jnp.bfloat16).astype(jnp.float32)
        w16 = w.astype(jnp.bfloat16).astype(jnp.float32)
        return jnp.sin(h16 @ w16 + b)

    h1 = layer(x, p["w1"], p["b1"])
    h2 = layer(h1, p["w2"], p["b2"])
    return layer(h2, p["w3"], p["b3"])


if __name__ == "__main__":
    key = jax.random.PRNGKey(0)
    k_param, k_x = jax.random.split(key)

    N, D_in, H, D_out = 8, 4, 32, 2
    params = init_sinenet_params(k_param, D_in, H, D_out)
    prepared = prepare_params(params)
    x = jax.random.normal(k_x, (N, D_in), jnp.float32)

    out = sinenet_forward(x, prepared)
    out = jax.block_until_ready(out)

    ref = sinenet_reference(x, params)
    assert out.shape == (N, D_out)
    assert jnp.allclose(out, ref, atol=5e-3, rtol=5e-3), "mismatch vs reference"

    print("KERNEL_OK")
</pallas_src>

<mosaic_0001>
module attributes {stable_mosaic.version = 11 : i64} {
  func.func @sinenet_kernel(%arg0: i32, %arg1: memref<16x128xbf16, #tpu.memory_space<vmem>>, %arg2: memref<128x128xbf16, #tpu.memory_space<vmem>>, %arg3: memref<1x128xf32, #tpu.memory_space<vmem>>, %arg4: memref<128x128xbf16, #tpu.memory_space<vmem>>, %arg5: memref<1x128xf32, #tpu.memory_space<vmem>>, %arg6: memref<128x128xbf16, #tpu.memory_space<vmem>>, %arg7: memref<1x128xf32, #tpu.memory_space<vmem>>, %arg8: memref<16x128xf32, #tpu.memory_space<vmem>>) attributes {dimension_semantics = [#tpu.dimension_semantics<parallel>], iteration_bounds = array<i64: 1>, scalar_prefetch = 0 : i64, scratch_operands = 0 : i64, tpu.core_type = #tpu.core_type<tc>, window_params = [{transform_indices = @transform_0, window_bounds = array<i64: 16, 128>}, {pipeline_mode = #tpu.pipeline_mode<synchronous>, transform_indices = @transform_1, window_bounds = array<i64: 128, 128>}, {pipeline_mode = #tpu.pipeline_mode<synchronous>, transform_indices = @transform_2, window_bounds = array<i64: 1, 128>}, {pipeline_mode = #tpu.pipeline_mode<synchronous>, transform_indices = @transform_3, window_bounds = array<i64: 128, 128>}, {pipeline_mode = #tpu.pipeline_mode<synchronous>, transform_indices = @transform_4, window_bounds = array<i64: 1, 128>}, {pipeline_mode = #tpu.pipeline_mode<synchronous>, transform_indices = @transform_5, window_bounds = array<i64: 128, 128>}, {pipeline_mode = #tpu.pipeline_mode<synchronous>, transform_indices = @transform_6, window_bounds = array<i64: 1, 128>}, {transform_indices = @transform_7, window_bounds = array<i64: 16, 128>}]} {
    %c0 = arith.constant 0 : index
    %c0_0 = arith.constant 0 : index
    %0 = vector.load %arg1[%c0, %c0_0] : memref<16x128xbf16, #tpu.memory_space<vmem>>, vector<16x128xbf16>
    %c0_1 = arith.constant 0 : index
    %c0_2 = arith.constant 0 : index
    %1 = vector.load %arg2[%c0_1, %c0_2] : memref<128x128xbf16, #tpu.memory_space<vmem>>, vector<128x128xbf16>
    %cst = arith.constant dense<0.000000e+00> : vector<16x128xf32>
    %2 = tpu.matmul %0, %1, %cst {dimension_numbers = #tpu.dot_dimension_numbers<[1], [0], [0], [1], [0, 0, 1, 1], [], []>} : vector<16x128xbf16>, vector<128x128xbf16>, vector<16x128xf32> -> vector<16x128xf32>
    %c0_3 = arith.constant 0 : index
    %c0_4 = arith.constant 0 : index
    %3 = vector.load %arg3[%c0_3, %c0_4] : memref<1x128xf32, #tpu.memory_space<vmem>>, vector<1x128xf32>
    %4 = vector.broadcast %3 : vector<1x128xf32> to vector<16x128xf32>
    %5 = arith.addf %2, %4 : vector<16x128xf32>
    %6 = math.sin %5 : vector<16x128xf32>
    %7 = arith.truncf %6 : vector<16x128xf32> to vector<16x128xbf16>
    %c0_5 = arith.constant 0 : index
    %c0_6 = arith.constant 0 : index
    %8 = vector.load %arg4[%c0_5, %c0_6] : memref<128x128xbf16, #tpu.memory_space<vmem>>, vector<128x128xbf16>
    %cst_7 = arith.constant dense<0.000000e+00> : vector<16x128xf32>
    %9 = tpu.matmul %7, %8, %cst_7 {dimension_numbers = #tpu.dot_dimension_numbers<[1], [0], [0], [1], [0, 0, 1, 1], [], []>} : vector<16x128xbf16>, vector<128x128xbf16>, vector<16x128xf32> -> vector<16x128xf32>
    %c0_8 = arith.constant 0 : index
    %c0_9 = arith.constant 0 : index
    %10 = vector.load %arg5[%c0_8, %c0_9] : memref<1x128xf32, #tpu.memory_space<vmem>>, vector<1x128xf32>
    %11 = vector.broadcast %10 : vector<1x128xf32> to vector<16x128xf32>
    %12 = arith.addf %9, %11 : vector<16x128xf32>
    %13 = math.sin %12 : vector<16x128xf32>
    %14 = arith.truncf %13 : vector<16x128xf32> to vector<16x128xbf16>
    %c0_10 = arith.constant 0 : index
    %c0_11 = arith.constant 0 : index
    %15 = vector.load %arg6[%c0_10, %c0_11] : memref<128x128xbf16, #tpu.memory_space<vmem>>, vector<128x128xbf16>
    %cst_12 = arith.constant dense<0.000000e+00> : vector<16x128xf32>
    %16 = tpu.matmul %14, %15, %cst_12 {dimension_numbers = #tpu.dot_dimension_numbers<[1], [0], [0], [1], [0, 0, 1, 1], [], []>} : vector<16x128xbf16>, vector<128x128xbf16>, vector<16x128xf32> -> vector<16x128xf32>
    %c0_13 = arith.constant 0 : index
    %c0_14 = arith.constant 0 : index
    %17 = vector.load %arg7[%c0_13, %c0_14] : memref<1x128xf32, #tpu.memory_space<vmem>>, vector<1x128xf32>
    %18 = vector.broadcast %17 : vector<1x128xf32> to vector<16x128xf32>
    %19 = arith.addf %16, %18 : vector<16x128xf32>
    %20 = math.sin %19 : vector<16x128xf32>
    %c0_15 = arith.constant 0 : index
    %c0_16 = arith.constant 0 : index
    %21 = vector.load %arg8[%c0_15, %c0_16] : memref<16x128xf32, #tpu.memory_space<vmem>>, vector<16x128xf32>
    tpu.vector_store %arg8[%c0_15, %c0_16], %20 {strides = array<i32>} : memref<16x128xf32, #tpu.memory_space<vmem>>, vector<16x128xf32>,
    return
  }
  func.func @transform_0(%arg0: i32) -> (i32, i32) {
    %c0_i32 = arith.constant 0 : i32
    %c0_i32_0 = arith.constant 0 : i32
    return %arg0, %c0_i32 : i32, i32
  }
  func.func @transform_1(%arg0: i32) -> (i32, i32) {
    %c0_i32 = arith.constant 0 : i32
    %c0_i32_0 = arith.constant 0 : i32
    %c0_i32_1 = arith.constant 0 : i32
    return %c0_i32, %c0_i32_0 : i32, i32
  }
  func.func @transform_2(%arg0: i32) -> (i32, i32) {
    %c0_i32 = arith.constant 0 : i32
    %c0_i32_0 = arith.constant 0 : i32
    %c0_i32_1 = arith.constant 0 : i32
    return %c0_i32, %c0_i32_0 : i32, i32
  }
  func.func @transform_3(%arg0: i32) -> (i32, i32) {
    %c0_i32 = arith.constant 0 : i32
    %c0_i32_0 = arith.constant 0 : i32
    %c0_i32_1 = arith.constant 0 : i32
    return %c0_i32, %c0_i32_0 : i32, i32
  }
  func.func @transform_4(%arg0: i32) -> (i32, i32) {
    %c0_i32 = arith.constant 0 : i32
    %c0_i32_0 = arith.constant 0 : i32
    %c0_i32_1 = arith.constant 0 : i32
    return %c0_i32, %c0_i32_0 : i32, i32
  }
  func.func @transform_5(%arg0: i32) -> (i32, i32) {
    %c0_i32 = arith.constant 0 : i32
    %c0_i32_0 = arith.constant 0 : i32
    %c0_i32_1 = arith.constant 0 : i32
    return %c0_i32, %c0_i32_0 : i32, i32
  }
  func.func @transform_6(%arg0: i32) -> (i32, i32) {
    %c0_i32 = arith.constant 0 : i32
    %c0_i32_0 = arith.constant 0 : i32
    %c0_i32_1 = arith.constant 0 : i32
    return %c0_i32, %c0_i32_0 : i32, i32
  }
  func.func @transform_7(%arg0: i32) -> (i32, i32) {
    %c0_i32 = arith.constant 0 : i32
    %c0_i32_0 = arith.constant 0 : i32
    return %arg0, %c0_i32 : i32, i32
  }
}

</mosaic_0001>

<bundles_post_ra>
// kernel: tpu_custom_call.1
= control target key start
LH: loop header
LB: loop body
LE: loop exit
PB: predicated region body
PF: predicated region fallthrough
CT: control target
= control target key end

     0   :  { %12 = vsyncpa [#allocation3], 0  ;;  %s2190_s0 = inlined_call_operand.hbm [shape: bf16[16,128], index: 0, kind: input, shape index: {}]   ;;  %s2191_s1 = inlined_call_operand.hbm [shape: bf16[128,128], index: 1, kind: input, shape index: {}]   ;;  %s2192_s2 = inlined_call_operand.vmem [shape: f32[1,128], index: 2, kind: input, shape index: {}]   ;;  %s2193_s3 = inlined_call_operand.hbm [shape: bf16[128,128], index: 3, kind: input, shape index: {}]   ;;  %s2194_s4 = inlined_call_operand.vmem [shape: f32[1,128], index: 4, kind: input, shape index: {}]   ;;  %s2195_s5 = inlined_call_operand.hbm [shape: bf16[128,128], index: 5, kind: input, shape index: {}]   ;;  %s2196_s6 = inlined_call_operand.vmem [shape: f32[1,128], index: 6, kind: input, shape index: {}]   ;;  %s2197_s7 = inlined_call_operand.hbm [shape: f32[16,128], index: 7, kind: output, shape index: {}]  }
   0x1   :  { %13 = vsyncpa [#allocation6], 0 }
   0x2   :  { %14 = vsyncpa [#allocation9], 0 }
   0x3   :  { %15 = vsyncpa [#allocation4], 0  ;;  %s33_s26 = sshll.u32 %s2191_s1, 4  ;;  %s1589_s27 = smov [#allocation5]   ;;  %s34_s26 = int_to_ptr.hbm [resolvable:$true] %s33_s26 }
   0x4   :  { %s35_s28 = sshll.u32 %s1589_s27, 4  ;;  %s20_s8 = sshll.u32 %s2190_s0, 4  ;;  %s36_s28 = int_to_ptr.vmem [resolvable:$true] %s35_s28  ;;  %s21_s8 = int_to_ptr.hbm [resolvable:$true] %s20_s8 }
   0x5   :  { %s1590_s9 = smov 64   ;;  %s1591_s10 = smov 4  }
   0x6   :  { %41 = dma.hbm_to_vmem [thread:$0]  %s34_s26, 1024, %s36_s28, [#allocation6], %s1590_s9, %s1590_s9, %s1591_s10  }
   0x7   :  { %s1592_s11 = smov [#allocation2]   ;;  %s48_s15 = sshll.u32 %s2193_s3, 4  ;;  %s49_s15 = int_to_ptr.hbm [resolvable:$true] %s48_s15 }
   0x8   :  { %s22_s12 = sshll.u32 %s1592_s11, 4  ;;  %s63_s17 = sshll.u32 %s2195_s5, 4  ;;  %s23_s12 = int_to_ptr.vmem [resolvable:$true] %s22_s12  ;;  %s64_s17 = int_to_ptr.hbm [resolvable:$true] %s63_s17 }
   0x9   :  { %28 = dma.hbm_to_vmem [thread:$0]  %s21_s8, 128, %s23_s12, [#allocation3], %s1590_s9, %s1590_s9, %s1591_s10  }
   0xa   :  { %s1593_s18 = smov [#allocation7]   ;;  %s1594_s0 = smov [#allocation8]  }
   0xb   :  { %s50_s19 = sshll.u32 %s1593_s18, 4  ;;  %s65_s20 = sshll.u32 %s1594_s0, 4  ;;  %s51_s19 = int_to_ptr.vmem [resolvable:$true] %s50_s19  ;;  %s66_s20 = int_to_ptr.vmem [resolvable:$true] %s65_s20 }
   0xc   :  { %56 = dma.hbm_to_vmem [thread:$0]  %s49_s15, 1024, %s51_s19, [#allocation6], %s1590_s9, %s1590_s9, %s1591_s10  }
   0xd   :  { %71 = dma.hbm_to_vmem [thread:$0]  %s64_s17, 1024, %s66_s20, [#allocation9], %s1590_s9, %s1590_s9, %s1591_s10  }
   0xe   :  { %1581 = dma.done.wait [#allocation3], 128  }
   0xf   :  { %1582 = vsyncadd [#allocation3], 4294967168 }
  0x10   :  { %1583 = dma.done.wait [#allocation6], 2048  }
  0x11   :  { %1584 = vsyncadd [#allocation6], 4294965248 }
  0x12   :  { %1585 = dma.done.wait [#allocation9], 1024  }
  0x13   :  { %1586 = vsyncadd [#allocation9], 4294966272  ;;  %v1425_v0 = vld [vmem:[#allocation5 + $0x38] sm:$0xff]  ;;  %v1424_v1 = vld [vmem:[#allocation5 + $0x30] sm:$0xff]  ;;  %v1595_v30 = vmov 683565275  }
  0x14   :  { %166 = vmatpush.bf16.msra.mxu0 %v1425_v0  ;;  %v1423_v2 = vld [vmem:[#allocation5 + $0x28] sm:$0xff]  ;;  %v1422_v3 = vld [vmem:[#allocation5 + $0x20] sm:$0xff]  ;;  %v1421_v4 = vld [vmem:[#allocation5 + $0x18] sm:$0xff]  ;;  %v1596_v32 = vmov 2475754826   ;;  %s1284_s26 = sshll.u32 %s2197_s7, 4  ;;  %s1285_s26 = int_to_ptr.hbm [resolvable:$true] %s1284_s26 }
  0x15   :  { %v1420_v5 = vld [vmem:[#allocation5 + $0x10] sm:$0xff]  ;;  %v1419_v6 = vld [vmem:[#allocation5 + $0x8] sm:$0xff]  ;;  %v1418_v7 = vld [vmem:[#allocation5] sm:$0xff]  ;;  %v1597_v37 = vmov 2131351028   ;;  %s1603_s27 = smov 128  }
  0x16   :  { %v1417_v8 = vld [vmem:[#allocation2] sm:$0xff]  ;;  %v1432_v35 = vld [vmem:[#allocation7 + $0x30] sm:$0xff]  ;;  %v1598_v40 = vmov 2102212464   ;;  %v1599_v43 = vmov 920167782  }
  0x17   :  { %v1458_v9 = vld [vmem:[%s2192_s2] ss:$0 sm:$0xff]  ;;  %v1600_v46 = vmov 1326507024   ;;  %v1431_v54 = vld [vmem:[#allocation7 + $0x28] sm:$0xff]  ;;  %s1604_s28 = smov 8  }
  0x18   :  { %167 = vmatpush.bf16.msra.mxu0 %v1424_v1  ;;  %v1433_v25 = vld [vmem:[#allocation7 + $0x38] sm:$0xff] }
  0x19   :  { %559 = vmatpush.bf16.msra.mxu1 %v1433_v25 }
  0x1c   :  { %168 = vmatpush.bf16.msra.mxu0 %v1423_v2  ;;  %v1430_v2 = vld [vmem:[#allocation7 + $0x20] sm:$0xff] }
  0x1d   :  { %560 = vmatpush.bf16.msra.mxu1 %v1432_v35 }
  0x20   :  { %169 = vmatpush.bf16.msra.mxu0 %v1422_v3 }
  0x21   :  { %561 = vmatpush.bf16.msra.mxu1 %v1431_v54 }
  0x24   :  { %170 = vmatpush.bf16.msra.mxu0 %v1421_v4 }
  0x25   :  { %562 = vmatpush.bf16.msra.mxu1 %v1430_v2 }
  0x28   :  { %171 = vmatpush.bf16.msra.mxu0 %v1420_v5 }
  0x2c   :  { %172 = vmatpush.bf16.msra.mxu0 %v1419_v6 }
  0x30   :  { %173 = vmatpush.bf16.msra.mxu0 %v1418_v7 }
  0x33   :  { %174 = vmatmul.bf16.vlgmr.msra.gmra.mxu0 %v1417_v8 }
  0xb0   :  { %v175_v10 = vpop.f32.mrf.mxu0 }
  0xb1   :  { %v1660_v11 = vadd.f32 %v1458_v9, %v175_v10 }
  0xb3   :  { %v180_v12 = vand.u32 2147483647, %v1660_v11  ;;  %v183_v13 = vand.u32 2139095040, %v1660_v11 }
  0xb5   :  { %v184_v14 = vshrl.u32 %v183_v13, 23  ;;  %v187_v16 = vand.u32 8388607, %v180_v12 }
  0xb7   :  { %v1335_v15 = vadd.s32 4294967169, %v184_v14  ;;  %v188_v20 = vor.u32 8388608, %v187_v16  ;;  %v1429_v16 = vld [vmem:[#allocation7 + $0x18] sm:$0xff] }
  0xb8   :  { %v177_v17 = vpop.f32.mrf.mxu0  ;;  %563 = vmatpush.bf16.msra.mxu1 %v1429_v16 }
  0xb9   :  { %v190_v18 = vadd.s32 1, %v1335_v15  ;;  %v1666_v19 = vadd.f32 %v1458_v9, %v177_v17  ;;  %v1670_v27 = vshll.u32 %v188_v20, 8 }
  0xbb   :  { %vm191_vm0 = vcmp.gt.s32.totalorder %v190_v18, 0  ;;  %v335_v22 = vand.u32 2147483647, %v1666_v19  ;;  %v338_v23 = vand.u32 2139095040, %v1666_v19  ;;  %v1693_v5 = vand.u32 65535, %v1670_v27 }
  0xbc   :  { %v192_v21 = vsel %vm191_vm0, %v190_v18, 0  ;;  %v230_v14 = vshrl.u32 %v1670_v27, 16 }
  0xbd   :  { %v194_v24 = vand.u32 31, %v192_v21  ;;  %v339_v28 = vshrl.u32 %v338_v23, 23  ;;  %v193_v29 = vshrl.u32 %v192_v21, 5  ;;  %v342_v34 = vand.u32 8388607, %v335_v22 }
  0xbf   :  { %v195_v26 = vsub.s32 32, %v194_v24  ;;  %v197_v31 = vshll.u32 %v1595_v30, %v194_v24  ;;  %v200_v33 = vshll.u32 %v1596_v32, %v194_v24  ;;  %v203_v39 = vshll.u32 %v1597_v37, %v194_v24 }
  0xc0   :  { %v206_v42 = vshll.u32 %v1598_v40, %v194_v24  ;;  %v209_v45 = vshll.u32 %v1599_v43, %v194_v24  ;;  %v1338_v51 = vadd.s32 4294967169, %v339_v28  ;;  %vm212_vm1 = vcmp.lt.s32.totalorder %v193_v29, 1 }
  0xc1   :  { %v198_v36 = vshrl.u32 %v1596_v32, %v195_v26  ;;  %v201_v38 = vshrl.u32 %v1597_v37, %v195_v26  ;;  %v204_v41 = vshrl.u32 %v1598_v40, %v195_v26  ;;  %v207_v44 = vshrl.u32 %v1599_v43, %v195_v26 }
  0xc2   :  { %v210_v47 = vshrl.u32 %v1600_v46, %v195_v26  ;;  %vm215_vm2 = vcmp.lt.s32.totalorder %v193_v29, 4  ;;  %vm213_vm3 = vcmp.lt.s32.totalorder %v193_v29, 2  ;;  %vm214_vm4 = vcmp.lt.s32.totalorder %v193_v29, 3 }
  0xc3   :  { %v199_v48 = vor.u32 %v198_v36, %v197_v31  ;;  %v202_v49 = vor.u32 %v201_v38, %v200_v33  ;;  %v205_v50 = vor.u32 %v204_v41, %v203_v39  ;;  %v208_v52 = vor.u32 %v207_v44, %v206_v42  ;;  %v1428_v38 = vld [vmem:[#allocation7 + $0x10] sm:$0xff] }
  0xc4   :  { %v211_v53 = vor.u32 %v210_v47, %v209_v45  ;;  %v343_v59 = vor.u32 8388608, %v342_v34  ;;  %v345_v60 = vadd.s32 1, %v1338_v51  ;;  %v196_v61 = vshrl.u32 %v1595_v30, %v195_v26  ;;  %564 = vmatpush.bf16.msra.mxu1 %v1428_v38 }
  0xc5   :  { %v217_v55 = vsel %vm215_vm2, %v205_v50, 2102212464  ;;  %v224_v56 = vsel %vm212_vm1, %v202_v49, %v205_v50  ;;  %v221_v57 = vsel %vm215_vm2, %v208_v52, 920167782  ;;  %v220_v62 = vsel %vm212_vm1, %v199_v48, %v202_v49 }
  0xc6   :  { %v225_v58 = vsel %vm215_vm2, %v211_v53, 1326507024  ;;  %v222_v63 = vsel %vm214_vm4, %v205_v50, %v221_v57  ;;  %vm346_vm5 = vcmp.gt.s32.totalorder %v345_v60, 0  ;;  %v216_v3 = vsel %vm212_vm1, %v196_v61, %v199_v48 }
  0xc7   :  { %v226_v0 = vsel %vm214_vm4, %v208_v52, %v225_v58  ;;  %v218_v4 = vsel %vm214_vm4, %v202_v49, %v217_v55  ;;  %v1696_v7 = vsel %vm213_vm3, %v220_v62, %v222_v63  ;;  %v347_v9 = vsel %vm346_vm5, %v345_v60, 0 }
  0xc8   :  { %v227_v1 = vsel %vm213_vm3, %v224_v56, %v226_v0  ;;  %v1698_v10 = vshll.u32 %v343_v59, 8  ;;  %v349_v15 = vand.u32 31, %v347_v9  ;;  %v1705_v17 = vsel %vm213_vm3, %v216_v3, %v218_v4  ;;  %v1427_v56 = vld [vmem:[#allocation7 + $0x8] sm:$0xff] }
  0xc9   :  { %v232_v6 = vshrl.u32 %v227_v1, 16  ;;  %v231_v8 = vand.u32 65535, %v227_v1  ;;  %v253_v18 = vand.u32 65535, %v1696_v7  ;;  %v254_v20 = vshrl.u32 %v1696_v7, 16  ;;  %565 = vmatpush.bf16.msra.mxu1 %v1427_v56 }
  0xca   :  { %v1710_v24 = vsub.s32 32, %v349_v15  ;;  %v1713_v25 = vand.u32 65535, %v1698_v10  ;;  %v1716_v28 = vshrl.u32 %v347_v9, 5  ;;  %v352_v29 = vshll.u32 %v1595_v30, %v349_v15 }
  0xcb   :  { %v1701_v13 = vmul.u32 %v232_v6, %v1693_v5  ;;  %v233_v21 = vmul.u32 %v231_v8, %v1693_v5  ;;  %v236_v23 = vmul.u32 %v232_v6, %v230_v14  ;;  %v355_v31 = vshll.u32 %v1596_v32, %v349_v15 }
  0xcc   :  { %v353_v33 = vshrl.u32 %v1596_v32, %v1710_v24  ;;  %v356_v34 = vshrl.u32 %v1597_v37, %v1710_v24  ;;  %v358_v35 = vshll.u32 %v1597_v37, %v349_v15  ;;  %v359_v36 = vshrl.u32 %v1598_v40, %v1710_v24 }
  0xcd   :  { %v237_v26 = vshll.u32 %v1701_v13, 16  ;;  %v361_v39 = vshll.u32 %v1598_v40, %v349_v15  ;;  %v362_v41 = vshrl.u32 %v1599_v43, %v1710_v24  ;;  %v364_v42 = vshll.u32 %v1599_v43, %v349_v15 }
  0xce   :  { %v365_v44 = vshrl.u32 %v1600_v46, %v1710_v24  ;;  %v1733_v45 = vor.u32 %v353_v33, %v352_v29  ;;  %v1735_v47 = vor.u32 %v356_v34, %v355_v31  ;;  %v1737_v48 = vor.u32 %v359_v36, %v358_v35 }
  0xcf   :  { %v1739_v49 = vmul.u32 %v231_v8, %v230_v14  ;;  %vm1741_vm6 = vc.u32 %v233_v21, %v237_v26  ;;  %v363_v51 = vor.u32 %v362_v41, %v361_v39  ;;  %vm367_vm7 = vcmp.lt.s32.totalorder %v1716_v28, 1  ;;  %v1426_v8 = vld [vmem:[#allocation7] sm:$0xff] }
  0xd0   :  { %v366_v52 = vor.u32 %v365_v44, %v364_v42  ;;  %v1747_v53 = vmul.u32 %v254_v20, %v1693_v5  ;;  %vm370_vm8 = vcmp.lt.s32.totalorder %v1716_v28, 4  ;;  %v375_v54 = vsel %vm367_vm7, %v1733_v45, %v1735_v47  ;;  %566 = vmatpush.bf16.msra.mxu1 %v1426_v8 }
  0xd1   :  { %v379_v55 = vsel %vm367_vm7, %v1735_v47, %v1737_v48  ;;  %v243_v57 = vadd.s32 %v237_v26, %v233_v21  ;;  %vm369_vm9 = vcmp.lt.s32.totalorder %v1716_v28, 3  ;;  %v376_v58 = vsel %vm370_vm8, %v363_v51, 920167782 }
  0xd2   :  { %v380_v59 = vsel %vm370_vm8, %v366_v52, 1326507024  ;;  %vm368_vm10 = vcmp.lt.s32.totalorder %v1716_v28, 2  ;;  %v377_v60 = vsel %vm369_vm9, %v1737_v48, %v376_v58  ;;  %v1601_v62 = vmov 0  }
  0xd3   :  { %v381_v61 = vsel %vm369_vm9, %v363_v51, %v380_v59  ;;  %v242_v63 = vsel %vm1741_vm6, 1, %v1601_v62  ;;  %v378_v0 = vsel %vm368_vm10, %v375_v54, %v377_v60  ;;  %v239_v2 = vshll.u32 %v1739_v49, 16 }
  0xd4   :  { %v382_v1 = vsel %vm368_vm10, %v379_v55, %v381_v61  ;;  %v257_v3 = vmul.u32 %v253_v18, %v230_v14  ;;  %v385_v4 = vshrl.u32 %v1698_v10, 16  ;;  %v244_v9 = vadd.s32 %v242_v63, %v236_v23 }
  0xd5   :  { %v386_v6 = vand.u32 65535, %v382_v1  ;;  %v387_v7 = vshrl.u32 %v382_v1, 16  ;;  %v409_v15 = vshrl.u32 %v378_v0, 16  ;;  %vm245_vm11 = vc.u32 %v243_v57, %v239_v2 }
  0xd6   :  { %v255_v16 = vmul.u32 %v253_v18, %v1693_v5  ;;  %v259_v21 = vshll.u32 %v1747_v53, 16  ;;  %v258_v26 = vmul.u32 %v254_v20, %v230_v14  ;;  %v408_v31 = vand.u32 65535, %v378_v0 }
  0xd7   :  { %v389_v29 = vmul.u32 %v387_v7, %v1713_v25  ;;  %v238_v33 = vshrl.u32 %v1701_v13, 16  ;;  %v388_v34 = vmul.u32 %v386_v6, %v1713_v25  ;;  %v246_v35 = vsel %vm245_vm11, 1, %v1601_v62 }
  0xd8   :  { %v261_v36 = vshll.u32 %v257_v3, 16  ;;  %vm263_vm12 = vc.u32 %v255_v16, %v259_v21  ;;  %v248_v23 = vadd.s32 %v246_v35, %v244_v9  ;;  %v265_v5 = vadd.s32 %v259_v21, %v255_v16 }
  0xd9   :  { %v392_v38 = vshll.u32 %v389_v29, 16  ;;  %v264_v39 = vsel %vm263_vm12, 1, %v1601_v62  ;;  %v411_v18 = vmul.u32 %v409_v15, %v1713_v25  ;;  %v240_v14 = vshrl.u32 %v1739_v49, 16 }
  0xda   :  { %v266_v20 = vadd.s32 %v264_v39, %v258_v26  ;;  %v390_v41 = vmul.u32 %v386_v6, %v385_v4  ;;  %v249_v42 = vadd.s32 %v248_v23, %v238_v33  ;;  %vm267_vm14 = vc.u32 %v265_v5, %v261_v36 }
  0xdb   :  { %vm396_vm13 = vc.u32 %v388_v34, %v392_v38  ;;  %v398_v13 = vadd.s32 %v392_v38, %v388_v34  ;;  %v391_v44 = vmul.u32 %v387_v7, %v385_v4  ;;  %v260_v50 = vshrl.u32 %v1747_v53, 16 }
  0xdc   :  { %v268_v51 = vsel %vm267_vm14, 1, %v1601_v62  ;;  %v394_v52 = vshll.u32 %v390_v41, 16  ;;  %v397_v55 = vsel %vm396_vm13, 1, %v1601_v62  ;;  %v410_v56 = vmul.u32 %v408_v31, %v1713_v25 }
  0xdd   :  { %v270_v54 = vadd.s32 %v268_v51, %v266_v20  ;;  %v412_v57 = vmul.u32 %v408_v31, %v385_v4  ;;  %v250_v58 = vadd.s32 %v249_v42, %v240_v14  ;;  %v399_v49 = vadd.s32 %v397_v55, %v391_v44 }
  0xde   :  { %vm400_vm15 = vc.u32 %v398_v13, %v394_v52  ;;  %v414_v59 = vshll.u32 %v411_v18, 16  ;;  %v413_v60 = vmul.u32 %v409_v15, %v385_v4  ;;  %v262_v61 = vshrl.u32 %v257_v3, 16 }
  0xdf   :  { %v271_v63 = vadd.s32 %v270_v54, %v260_v50  ;;  %v401_v0 = vsel %vm400_vm15, 1, %v1601_v62  ;;  %v269_v1 = vadd.s32 %v265_v5, %v261_v36  ;;  %v393_v53 = vshrl.u32 %v389_v29, 16 }
  0xe0   :  { %v403_v2 = vadd.s32 %v401_v0, %v399_v49  ;;  %vm418_vm0 = vc.u32 %v410_v56, %v414_v59  ;;  %v416_v7 = vshll.u32 %v412_v57, 16  ;;  %v420_v9 = vadd.s32 %v414_v59, %v410_v56 }
  0xe1   :  { %v272_v6 = vadd.s32 %v271_v63, %v262_v61  ;;  %v419_v8 = vsel %vm418_vm0, 1, %v1601_v62  ;;  %vm275_vm1 = vc.u32 %v250_v58, %v269_v1  ;;  %v372_v4 = vsel %vm370_vm8, %v1737_v48, 2102212464 }
  0xe2   :  { %v404_v25 = vadd.s32 %v403_v2, %v393_v53  ;;  %v421_v16 = vadd.s32 %v419_v8, %v413_v60  ;;  %vm422_vm2 = vc.u32 %v420_v9, %v416_v7  ;;  %v273_v15 = vmul.u32 %v1670_v27, %v1705_v17 }
  0xe3   :  { %v276_v3 = vadd.s32 1, %v272_v6  ;;  %v351_v21 = vshrl.u32 %v1595_v30, %v1710_v24  ;;  %v395_v26 = vshrl.u32 %v390_v41, 16  ;;  %v423_v29 = vsel %vm422_vm2, 1, %v1601_v62 }
  0xe4   :  { %v415_v33 = vshrl.u32 %v411_v18, 16  ;;  %v425_v34 = vadd.s32 %v423_v29, %v421_v16  ;;  %v373_v48 = vsel %vm369_vm9, %v1735_v47, %v372_v4  ;;  %v417_v27 = vshrl.u32 %v412_v57, 16 }
  0xe5   :  { %v277_v31 = vsel %vm275_vm1, %v276_v3, %v272_v6  ;;  %v371_v35 = vsel %vm367_vm7, %v351_v21, %v1733_v45  ;;  %v405_v38 = vadd.s32 %v404_v25, %v395_v26  ;;  %v424_v24 = vadd.s32 %v420_v9, %v416_v7 }
  0xe6   :  { %v278_v36 = vadd.s32 %v277_v31, %v273_v15  ;;  %v426_v17 = vadd.s32 %v425_v34, %v415_v33  ;;  %v374_v39 = vsel %vm368_vm10, %v371_v35, %v373_v48  ;;  %v274_v57 = vadd.s32 %v269_v1, %v250_v58 }
  0xe7   :  { %vm430_vm3 = vc.u32 %v405_v38, %v424_v24  ;;  %v428_v45 = vmul.u32 %v1698_v10, %v374_v39  ;;  %v429_v9 = vadd.s32 %v424_v24, %v405_v38  ;;  %vm182_vm8 = vcmp.lt.s32.totalorder %v1660_v11, 0 }
  0xe8   :  { %v279_v23 = vadd.s32 536870912, %v278_v36  ;;  %v427_v5 = vadd.s32 %v426_v17, %v417_v27  ;;  %vm1819_vm9 = vcmp.le.f32.partialorder %v180_v12, 0.7853982  ;;  %vm337_vm10 = vcmp.lt.s32.totalorder %v1666_v19, 0 }
  0xe9   :  { %vm1832_vm11 = vcmp.le.f32.partialorder %v335_v22, 0.7853982  ;;  %vm323_vm2 = vweird.f32 %v1660_v11 }
  0xea   :  { %v1809_v18 = vshrl.u32 %v279_v23, 30  ;;  %v431_v14 = vadd.s32 1, %v427_v5 }
  0xec   :  { %v281_v20 = vshll.u32 %v1809_v18, 30  ;;  %v432_v41 = vsel %vm430_vm3, %v431_v14, %v427_v5  ;;  %v304_v5 = vsub.s32 4, %v1809_v18  ;;  %vm478_vm3 = vweird.f32 %v1666_v19 }
  0xed   :  { %v433_v13 = vadd.s32 %v432_v41, %v428_v45 }
  0xee   :  { %v282_v47 = vsub.s32 %v278_v36, %v281_v20 }
  0xef   :  { %v434_v44 = vadd.s32 536870912, %v433_v13 }
  0xf0   :  { %vm283_vm4 = vcmp.lt.s32.totalorder %v282_v47, 0  ;;  %v284_v42 = vsub.s32 0, %v282_v47 }
  0xf1   :  { %v1813_v51 = vshrl.u32 %v434_v44, 30 }
  0xf2   :  { %v285_v50 = vsel %vm283_vm4, %v284_v42, %v282_v47  ;;  %v305_v42 = vsel %vm182_vm8, %v304_v5, %v1809_v18 }
  0xf3   :  { %v286_v28 = vclz %v285_v50  ;;  %v436_v52 = vshll.u32 %v1813_v51, 30  ;;  %v459_v44 = vsub.s32 4, %v1813_v51  ;;  %v307_v22 = vsel %vm1819_vm9, 0, %v305_v42 }
  0xf5   :  { %v1336_v54 = vadd.s32 4294967294, %v286_v28  ;;  %v437_v55 = vsub.s32 %v433_v13, %v436_v52 }
  0xf7   :  { %vm1337_vm5 = vcmp.lt.s32.totalorder %v1336_v54, 0  ;;  %vm438_vm6 = vcmp.lt.s32.totalorder %v437_v55, 0  ;;  %v439_v10 = vsub.s32 0, %v437_v55 }
  0xf8   :  { %v289_v56 = vsel %vm1337_vm5, 0, %v1336_v54 }
  0xf9   :  { %v290_v49 = vsub.s32 32, %v289_v56  ;;  %v294_v59 = vsub.s32 4294967266, %v289_v56  ;;  %v440_v60 = vsel %vm438_vm6, %v439_v10, %v437_v55  ;;  %v291_v61 = vshll.u32 %v282_v47, %v289_v56 }
  0xfa   :  { %v441_v53 = vclz %v440_v60 }
  0xfb   :  { %v292_v63 = vshrl.u32 %v274_v57, %v290_v49  ;;  %v295_v0 = vadd.s32 127, %v294_v59  ;;  %v460_v57 = vsel %vm337_vm10, %v459_v44, %v1813_v51 }
  0xfc   :  { %v1339_v7 = vadd.s32 4294967294, %v441_v53 }
  0xfd   :  { %v293_v2 = vor.u32 %v292_v63, %v291_v61  ;;  %v296_v6 = vshll.u32 %v295_v0, 23  ;;  %v324_v61 = vadd.s32 3, %v307_v22  ;;  %v462_v0 = vsel %vm1832_vm11, 0, %v460_v57 }
  0xfe   :  { %vm1340_vm7 = vcmp.lt.s32.totalorder %v1339_v7, 0 }
  0xff   :  { %v297_v8 = vor.u32 4788187, %v296_v6  ;;  %v444_v25 = vsel %vm1340_vm7, 0, %v1339_v7  ;;  %v300_v4 = vcvt.s32.f32 %v293_v2 }
 0x100   :  { %v445_v3 = vsub.s32 32, %v444_v25  ;;  %v449_v15 = vsub.s32 4294967266, %v444_v25  ;;  %v446_v58 = vshll.u32 %v437_v55, %v444_v25  ;;  %v479_v25 = vadd.s32 3, %v462_v0 }
 0x101   :  { %v298_v16 = vand.u32 2147483647, %v297_v8 }
 0x102   :  { %v447_v1 = vshrl.u32 %v429_v9, %v445_v3  ;;  %v450_v26 = vadd.s32 127, %v449_v15  ;;  %v325_v9 = vand.u32 3, %v324_v61 }
 0x103   :  { %v301_v21 = vmul.f32 %v300_v4, %v298_v16 }
 0x104   :  { %v448_v31 = vor.u32 %v447_v1, %v446_v58  ;;  %v451_v33 = vshll.u32 %v450_v26, 23  ;;  %vm327_vm12 = vcmp.eq.s32.totalorder %v325_v9, 0  ;;  %v480_v58 = vand.u32 3, %v479_v25 }
 0x105   :  { %v302_v29 = vxor.u32 2147483648, %v301_v21  ;;  %vm330_vm13 = vcmp.eq.s32.totalorder %v325_v9, 2  ;;  %vm326_vm14 = vcmp.lt.s32.totalorder %v325_v9, 2 }
 0x106   :  { %v452_v48 = vor.u32 4788187, %v451_v33  ;;  %v455_v17 = vcvt.s32.f32 %v448_v31  ;;  %vm482_vm15 = vcmp.eq.s32.totalorder %v480_v58, 0  ;;  %vm485_vm0 = vcmp.eq.s32.totalorder %v480_v58, 2 }
 0x107   :  { %v303_v35 = vsel %vm182_vm8, %v302_v29, %v301_v21  ;;  %vm481_vm1 = vcmp.lt.s32.totalorder %v480_v58, 2 }
 0x108   :  { %v306_v36 = vsel %vm1819_vm9, %v1660_v11, %v303_v35  ;;  %v453_v27 = vand.u32 2147483647, %v452_v48 }
 0x109   :  { %v308_v38 = vmul.f32 %v306_v36, %v306_v36 }
 0x10a   :  { %v456_v39 = vmul.f32 %v455_v17, %v453_v27 }
 0x10b   :  { %v309_v23 = vmul.f32 -0.001358992, %v308_v38  ;;  %v316_v24 = vmul.f32 -0.00019511016, %v308_v38 }
 0x10c   :  { %v457_v45 = vxor.u32 2147483648, %v456_v39 }
 0x10d   :  { %v310_v12 = vadd.f32 0.041655596, %v309_v23  ;;  %v317_v14 = vadd.f32 0.008332121, %v316_v24  ;;  %v1459_v23 = vld [vmem:[%s2194_s4] ss:$0 sm:$0xff] }
 0x10e   :  { %v458_v13 = vsel %vm337_vm10, %v457_v45, %v456_v39 }
 0x10f   :  { %v311_v20 = vmul.f32 %v310_v12, %v308_v38  ;;  %v318_v41 = vmul.f32 %v317_v14, %v308_v38  ;;  %v461_v50 = vsel %vm1832_vm11, %v1666_v19, %v458_v13 }
 0x110   :  { %v463_v54 = vmul.f32 %v461_v50, %v461_v50 }
 0x111   :  { %v312_v28 = vadd.f32 -0.4999988, %v311_v20  ;;  %v319_v52 = vadd.f32 -0.16666654, %v318_v41 }
 0x112   :  { %v464_v56 = vmul.f32 -0.001358992, %v463_v54  ;;  %v471_v10 = vmul.f32 -0.00019511016, %v463_v54 }
 0x113   :  { %v320_v55 = vmul.f32 %v319_v52, %v308_v38  ;;  %v313_v49 = vmul.f32 %v312_v28, %v308_v38  ;;  %v1441_v28 = vld [vmem:[#allocation8 + $0x38] sm:$0xff] }
 0x114   :  { %v465_v18 = vadd.f32 0.041655596, %v464_v56  ;;  %v472_v60 = vadd.f32 0.008332121, %v471_v10  ;;  %952 = vmatpush.bf16.msra.mxu2 %v1441_v28 }
 0x115   :  { %v321_v59 = vadd.f32 1.0, %v320_v55  ;;  %v314_v6 = vadd.f32 1.0, %v313_v49  ;;  %v1440_v49 = vld [vmem:[#allocation8 + $0x30] sm:$0xff] }
 0x116   :  { %v466_v53 = vmul.f32 %v465_v18, %v463_v54  ;;  %v473_v2 = vmul.f32 %v472_v60, %v463_v54 }
 0x117   :  { %v322_v63 = vmul.f32 %v321_v59, %v306_v36  ;;  %v331_v51 = vxor.u32 2147483648, %v314_v6 }
 0x118   :  { %v467_v7 = vadd.f32 -0.4999988, %v466_v53  ;;  %v474_v8 = vadd.f32 -0.16666654, %v473_v2  ;;  %953 = vmatpush.bf16.msra.mxu2 %v1440_v49 }
 0x119   :  { %v328_v16 = vxor.u32 2147483648, %v322_v63  ;;  %v332_v31 = vsel %vm330_vm13, %v331_v51, %v322_v63 }
 0x11a   :  { %v468_v4 = vmul.f32 %v467_v7, %v463_v54  ;;  %v475_v3 = vmul.f32 %v474_v8, %v463_v54 }
 0x11b   :  { %v329_v1 = vsel %vm327_vm12, %v314_v6, %v328_v16 }
 0x11c   :  { %v469_v15 = vadd.f32 1.0, %v468_v4  ;;  %v476_v21 = vadd.f32 1.0, %v475_v3  ;;  %v333_v34 = vsel %vm326_vm14, %v329_v1, %v332_v31  ;;  %v1439_v4 = vld [vmem:[#allocation8 + $0x28] sm:$0xff] }
 0x11d   :  { %v334_v38 = vsel %vm323_vm2, nan, %v333_v34  ;;  %954 = vmatpush.bf16.msra.mxu2 %v1439_v4 }
 0x11e   :  { %v477_v26 = vmul.f32 %v476_v21, %v461_v50  ;;  %v486_v29 = vxor.u32 2147483648, %v469_v15 }
 0x120   :  { %v483_v33 = vxor.u32 2147483648, %v477_v26  ;;  %v487_v48 = vsel %vm485_vm0, %v486_v29, %v477_v26 }
 0x122   :  { %v484_v35 = vsel %vm482_vm15, %v469_v15, %v483_v33 }
 0x123   :  { %v488_v36 = vsel %vm481_vm1, %v484_v35, %v487_v48  ;;  %v1438_v35 = vld [vmem:[#allocation8 + $0x20] sm:$0xff] }
 0x124   :  { %v489_v27 = vsel %vm478_vm3, nan, %v488_v36  ;;  %955 = vmatpush.bf16.msra.mxu2 %v1438_v35 }
 0x125   :  { %v490_v17 = vpack.c.bf16 %v489_v27, %v334_v38 }
 0x127   :  { %567 = vmatmul.bf16.vlgmr.msra.gmra.mxu1 %v490_v17 }
 0x1a4   :  { %v568_v24 = vpop.f32.mrf.mxu1 }
 0x1a5   :  { %v1853_v39 = vadd.f32 %v1459_v23, %v568_v24 }
 0x1a7   :  { %v573_v5 = vand.u32 2147483647, %v1853_v39  ;;  %v576_v12 = vand.u32 2139095040, %v1853_v39 }
 0x1a9   :  { %v577_v14 = vshrl.u32 %v576_v12, 23  ;;  %v580_v19 = vand.u32 8388607, %v573_v5 }
 0x1ab   :  { %v1373_v11 = vadd.s32 4294967169, %v577_v14  ;;  %v581_v47 = vor.u32 8388608, %v580_v19 }
 0x1ac   :  { %v570_v45 = vpop.f32.mrf.mxu1 }
 0x1ad   :  { %v583_v20 = vadd.s32 1, %v1373_v11  ;;  %v1859_v41 = vadd.f32 %v1459_v23, %v570_v45  ;;  %v1863_v54 = vshll.u32 %v581_v47, 8  ;;  %v1437_v45 = vld [vmem:[#allocation8 + $0x18] sm:$0xff] }
 0x1ae   :  { %956 = vmatpush.bf16.msra.mxu2 %v1437_v45 }
 0x1af   :  { %vm584_vm4 = vcmp.gt.s32.totalorder %v583_v20, 0  ;;  %v728_v42 = vand.u32 2147483647, %v1859_v41  ;;  %v731_v44 = vand.u32 2139095040, %v1859_v41  ;;  %v1886_v38 = vand.u32 65535, %v1863_v54 }
 0x1b0   :  { %v585_v13 = vsel %vm584_vm4, %v583_v20, 0  ;;  %v623_v11 = vshrl.u32 %v1863_v54, 16 }
 0x1b1   :  { %v587_v50 = vand.u32 31, %v585_v13  ;;  %v732_v22 = vshrl.u32 %v731_v44, 23  ;;  %v586_v55 = vshrl.u32 %v585_v13, 5  ;;  %v735_v57 = vand.u32 8388607, %v728_v42 }
 0x1b3   :  { %v588_v52 = vsub.s32 32, %v587_v50  ;;  %v590_v56 = vshll.u32 %v1595_v30, %v587_v50  ;;  %v593_v10 = vshll.u32 %v1596_v32, %v587_v50  ;;  %v596_v60 = vshll.u32 %v1597_v37, %v587_v50 }
 0x1b4   :  { %v599_v63 = vshll.u32 %v1598_v40, %v587_v50  ;;  %v602_v53 = vshll.u32 %v1599_v43, %v587_v50  ;;  %v1376_v9 = vadd.s32 4294967169, %v732_v22  ;;  %vm605_vm5 = vcmp.lt.s32.totalorder %v586_v55, 1 }
 0x1b5   :  { %v591_v59 = vshrl.u32 %v1596_v32, %v588_v52  ;;  %v594_v18 = vshrl.u32 %v1597_v37, %v588_v52  ;;  %v597_v61 = vshrl.u32 %v1598_v40, %v588_v52  ;;  %v600_v0 = vshrl.u32 %v1599_v43, %v588_v52 }
 0x1b6   :  { %v603_v2 = vshrl.u32 %v1600_v46, %v588_v52  ;;  %vm608_vm6 = vcmp.lt.s32.totalorder %v586_v55, 4  ;;  %vm606_vm7 = vcmp.lt.s32.totalorder %v586_v55, 2  ;;  %vm607_vm8 = vcmp.lt.s32.totalorder %v586_v55, 3 }
 0x1b7   :  { %v592_v6 = vor.u32 %v591_v59, %v590_v56  ;;  %v595_v7 = vor.u32 %v594_v18, %v593_v10  ;;  %v598_v8 = vor.u32 %v597_v61, %v596_v60  ;;  %v601_v25 = vor.u32 %v600_v0, %v599_v63  ;;  %v1436_v60 = vld [vmem:[#allocation8 + $0x10] sm:$0xff] }
 0x1b8   :  { %v604_v16 = vor.u32 %v603_v2, %v602_v53  ;;  %v736_v58 = vor.u32 8388608, %v735_v57  ;;  %v738_v1 = vadd.s32 1, %v1376_v9  ;;  %v589_v26 = vshrl.u32 %v1595_v30, %v588_v52  ;;  %957 = vmatpush.bf16.msra.mxu2 %v1436_v60 }
 0x1b9   :  { %v610_v3 = vsel %vm608_vm6, %v598_v8, 2102212464  ;;  %v617_v51 = vsel %vm605_vm5, %v595_v7, %v598_v8  ;;  %v614_v15 = vsel %vm608_vm6, %v601_v25, 920167782  ;;  %v613_v29 = vsel %vm605_vm5, %v592_v6, %v595_v7 }
 0x1ba   :  { %v618_v21 = vsel %vm608_vm6, %v604_v16, 1326507024  ;;  %v615_v31 = vsel %vm607_vm8, %v598_v8, %v614_v15  ;;  %vm739_vm9 = vcmp.gt.s32.totalorder %v738_v1, 0  ;;  %v609_v48 = vsel %vm605_vm5, %v589_v26, %v592_v6  ;;  %v1435_v15 = vld [vmem:[#allocation8 + $0x8] sm:$0xff] }
 0x1bb   :  { %v619_v33 = vsel %vm607_vm8, %v601_v25, %v618_v21  ;;  %v611_v36 = vsel %vm607_vm8, %v595_v7, %v610_v3  ;;  %v1889_v17 = vsel %vm606_vm7, %v613_v29, %v615_v31  ;;  %v740_v24 = vsel %vm739_vm9, %v738_v1, 0 }
 0x1bc   :  { %v620_v34 = vsel %vm606_vm7, %v617_v51, %v619_v33  ;;  %v1891_v12 = vshll.u32 %v736_v58, 8  ;;  %v742_v19 = vand.u32 31, %v740_v24  ;;  %v1898_v20 = vsel %vm606_vm7, %v609_v48, %v611_v36  ;;  %958 = vmatpush.bf16.msra.mxu2 %v1435_v15 }
 0x1bd   :  { %v625_v27 = vshrl.u32 %v620_v34, 16  ;;  %v624_v23 = vand.u32 65535, %v620_v34  ;;  %v646_v47 = vand.u32 65535, %v1889_v17  ;;  %v647_v13 = vshrl.u32 %v1889_v17, 16 }
 0x1be   :  { %v1903_v28 = vsub.s32 32, %v742_v19  ;;  %v1906_v52 = vand.u32 65535, %v1891_v12  ;;  %v1909_v56 = vshrl.u32 %v740_v24, 5  ;;  %v745_v55 = vshll.u32 %v1595_v30, %v742_v19 }
 0x1bf   :  { %v1894_v14 = vmul.u32 %v625_v27, %v1886_v38  ;;  %v626_v44 = vmul.u32 %v624_v23, %v1886_v38  ;;  %v629_v50 = vmul.u32 %v625_v27, %v623_v11  ;;  %v748_v10 = vshll.u32 %v1596_v32, %v742_v19 }
 0x1c0   :  { %v746_v57 = vshrl.u32 %v1596_v32, %v1903_v28  ;;  %v749_v49 = vshrl.u32 %v1597_v37, %v1903_v28  ;;  %v751_v59 = vshll.u32 %v1597_v37, %v742_v19  ;;  %v752_v18 = vshrl.u32 %v1598_v40, %v1903_v28 }
 0x1c1   :  { %v630_v22 = vshll.u32 %v1894_v14, 16  ;;  %v754_v61 = vshll.u32 %v1598_v40, %v742_v19  ;;  %v755_v63 = vshrl.u32 %v1599_v43, %v1903_v28  ;;  %v757_v0 = vshll.u32 %v1599_v43, %v742_v19 }
 0x1c2   :  { %v758_v53 = vshrl.u32 %v1600_v46, %v1903_v28  ;;  %v1926_v2 = vor.u32 %v746_v57, %v745_v55  ;;  %v1928_v6 = vor.u32 %v749_v49, %v748_v10  ;;  %v1930_v7 = vor.u32 %v752_v18, %v751_v59 }
 0x1c3   :  { %v1932_v8 = vmul.u32 %v624_v23, %v623_v11  ;;  %vm1934_vm10 = vc.u32 %v626_v44, %v630_v22  ;;  %v756_v25 = vor.u32 %v755_v63, %v754_v61  ;;  %vm760_vm11 = vcmp.lt.s32.totalorder %v1909_v56, 1  ;;  %v1434_v23 = vld [vmem:[#allocation8] sm:$0xff] }
 0x1c4   :  { %v759_v16 = vor.u32 %v758_v53, %v757_v0  ;;  %v1940_v4 = vmul.u32 %v647_v13, %v1886_v38  ;;  %vm763_vm12 = vcmp.lt.s32.totalorder %v1909_v56, 4  ;;  %v768_v3 = vsel %vm760_vm11, %v1926_v2, %v1928_v6  ;;  %959 = vmatpush.bf16.msra.mxu2 %v1434_v23 }
 0x1c5   :  { %v772_v51 = vsel %vm760_vm11, %v1928_v6, %v1930_v7  ;;  %v636_v21 = vadd.s32 %v630_v22, %v626_v44  ;;  %vm762_vm13 = vcmp.lt.s32.totalorder %v1909_v56, 3  ;;  %v769_v58 = vsel %vm763_vm12, %v756_v25, 920167782 }
 0x1c6   :  { %v773_v1 = vsel %vm763_vm12, %v759_v16, 1326507024  ;;  %vm761_vm14 = vcmp.lt.s32.totalorder %v1909_v56, 2  ;;  %v770_v26 = vsel %vm762_vm13, %v1930_v7, %v769_v58  ;;  %v635_v31 = vsel %vm1934_vm10, 1, %v1601_v62 }
 0x1c7   :  { %v774_v29 = vsel %vm762_vm13, %v756_v25, %v773_v1  ;;  %v771_v33 = vsel %vm761_vm14, %v768_v3, %v770_v26  ;;  %v632_v35 = vshll.u32 %v1932_v8, 16  ;;  %v650_v48 = vmul.u32 %v646_v47, %v623_v11 }
 0x1c8   :  { %v775_v34 = vsel %vm761_vm14, %v772_v51, %v774_v29  ;;  %v778_v36 = vshrl.u32 %v1891_v12, 16  ;;  %v637_v24 = vadd.s32 %v635_v31, %v629_v50  ;;  %v802_v19 = vshrl.u32 %v771_v33, 16 }
 0x1c9   :  { %v779_v27 = vand.u32 65535, %v775_v34  ;;  %v780_v17 = vshrl.u32 %v775_v34, 16  ;;  %vm638_vm15 = vc.u32 %v636_v21, %v632_v35  ;;  %v648_v45 = vmul.u32 %v646_v47, %v1886_v38 }
 0x1ca   :  { %v652_v44 = vshll.u32 %v1940_v4, 16  ;;  %v651_v22 = vmul.u32 %v647_v13, %v623_v11  ;;  %v801_v10 = vand.u32 65535, %v771_v33  ;;  %v631_v57 = vshrl.u32 %v1894_v14, 16 }
 0x1cb   :  { %v782_v55 = vmul.u32 %v780_v17, %v1906_v52  ;;  %v781_v49 = vmul.u32 %v779_v27, %v1906_v52  ;;  %v639_v59 = vsel %vm638_vm15, 1, %v1601_v62  ;;  %v654_v18 = vshll.u32 %v650_v48, 16 }
 0x1cc   :  { %vm656_vm0 = vc.u32 %v648_v45, %v652_v44  ;;  %v641_v50 = vadd.s32 %v639_v59, %v637_v24  ;;  %v658_v38 = vadd.s32 %v652_v44, %v648_v45  ;;  %v804_v47 = vmul.u32 %v802_v19, %v1906_v52 }
 0x1cd   :  { %v785_v60 = vshll.u32 %v782_v55, 16  ;;  %v657_v61 = vsel %vm656_vm0, 1, %v1601_v62  ;;  %v633_v11 = vshrl.u32 %v1932_v8, 16  ;;  %v783_v63 = vmul.u32 %v779_v27, %v778_v36 }
 0x1ce   :  { %v659_v13 = vadd.s32 %v657_v61, %v651_v22  ;;  %v642_v0 = vadd.s32 %v641_v50, %v631_v57  ;;  %vm660_vm2 = vc.u32 %v658_v38, %v654_v18  ;;  %v784_v53 = vmul.u32 %v780_v17, %v778_v36 }
 0x1cf   :  { %vm789_vm1 = vc.u32 %v781_v49, %v785_v60  ;;  %v791_v14 = vadd.s32 %v785_v60, %v781_v49  ;;  %v653_v9 = vshrl.u32 %v1940_v4, 16  ;;  %v661_v25 = vsel %vm660_vm2, 1, %v1601_v62 }
 0x1d0   :  { %v787_v16 = vshll.u32 %v783_v63, 16  ;;  %v663_v3 = vadd.s32 %v661_v25, %v659_v13  ;;  %v790_v51 = vsel %vm789_vm1, 1, %v1601_v62  ;;  %v803_v15 = vmul.u32 %v801_v10, %v1906_v52 }
 0x1d1   :  { %v805_v21 = vmul.u32 %v801_v10, %v778_v36  ;;  %v643_v58 = vadd.s32 %v642_v0, %v633_v11  ;;  %v792_v8 = vadd.s32 %v790_v51, %v784_v53  ;;  %v807_v1 = vshll.u32 %v804_v47, 16 }
 0x1d2   :  { %vm793_vm3 = vc.u32 %v791_v14, %v787_v16  ;;  %v806_v26 = vmul.u32 %v802_v19, %v778_v36  ;;  %v655_v29 = vshrl.u32 %v650_v48, 16  ;;  %v664_v31 = vadd.s32 %v663_v3, %v653_v9 }
 0x1d3   :  { %v794_v33 = vsel %vm793_vm3, 1, %v1601_v62  ;;  %v662_v34 = vadd.s32 %v658_v38, %v654_v18  ;;  %v786_v4 = vshrl.u32 %v782_v55, 16  ;;  %vm811_vm4 = vc.u32 %v803_v15, %v807_v1 }
 0x1d4   :  { %v796_v35 = vadd.s32 %v794_v33, %v792_v8  ;;  %v665_v27 = vadd.s32 %v664_v31, %v655_v29  ;;  %v809_v17 = vshll.u32 %v805_v21, 16  ;;  %v812_v23 = vsel %vm811_vm4, 1, %v1601_v62 }
 0x1d5   :  { %v813_v24 = vadd.s32 %v807_v1, %v803_v15  ;;  %vm668_vm5 = vc.u32 %v643_v58, %v662_v34  ;;  %v814_v45 = vadd.s32 %v812_v23, %v806_v26  ;;  %v765_v36 = vsel %vm763_vm12, %v1930_v7, 2102212464 }
 0x1d6   :  { %v797_v52 = vadd.s32 %v796_v35, %v786_v4  ;;  %v669_v48 = vadd.s32 1, %v665_v27  ;;  %v666_v19 = vmul.u32 %v1863_v54, %v1898_v20  ;;  %v744_v44 = vshrl.u32 %v1595_v30, %v1903_v28 }
 0x1d7   :  { %vm815_vm6 = vc.u32 %v813_v24, %v809_v17  ;;  %v788_v22 = vshrl.u32 %v783_v63, 16  ;;  %v808_v57 = vshrl.u32 %v804_v47, 16  ;;  %v766_v7 = vsel %vm762_vm13, %v1928_v6, %v765_v36 }
 0x1d8   :  { %v816_v55 = vsel %vm815_vm6, 1, %v1601_v62  ;;  %v670_v10 = vsel %vm668_vm5, %v669_v48, %v665_v27  ;;  %v764_v59 = vsel %vm760_vm11, %v744_v44, %v1926_v2  ;;  %v810_v54 = vshrl.u32 %v805_v21, 16 }
 0x1d9   :  { %v818_v49 = vadd.s32 %v816_v55, %v814_v45  ;;  %v671_v18 = vadd.s32 %v670_v10, %v666_v19  ;;  %v798_v60 = vadd.s32 %v797_v52, %v788_v22  ;;  %v817_v28 = vadd.s32 %v813_v24, %v809_v17 }
 0x1da   :  { %v767_v61 = vsel %vm761_vm14, %v764_v59, %v766_v7  ;;  %v667_v21 = vadd.s32 %v662_v34, %v643_v58  ;;  %vm575_vm12 = vcmp.lt.s32.totalorder %v1853_v39, 0  ;;  %vm2012_vm13 = vcmp.le.f32.partialorder %v573_v5, 0.7853982 }
 0x1db   :  { %v819_v20 = vadd.s32 %v818_v49, %v808_v57  ;;  %v672_v50 = vadd.s32 536870912, %v671_v18  ;;  %vm823_vm7 = vc.u32 %v798_v60, %v817_v28  ;;  %v821_v2 = vmul.u32 %v1891_v12, %v767_v61 }
 0x1dc   :  { %v822_v24 = vadd.s32 %v817_v28, %v798_v60  ;;  %vm730_vm14 = vcmp.lt.s32.totalorder %v1859_v41, 0  ;;  %vm2025_vm15 = vcmp.le.f32.partialorder %v728_v42, 0.7853982  ;;  %vm716_vm6 = vweird.f32 %v1853_v39 }
 0x1dd   :  { %v820_v38 = vadd.s32 %v819_v20, %v810_v54  ;;  %v2002_v47 = vshrl.u32 %v672_v50, 30 }
 0x1df   :  { %v824_v11 = vadd.s32 1, %v820_v38  ;;  %v674_v13 = vshll.u32 %v2002_v47, 30 }
 0x1e1   :  { %v825_v63 = vsel %vm823_vm7, %v824_v11, %v820_v38  ;;  %v675_v6 = vsub.s32 %v671_v18, %v674_v13  ;;  %v697_v38 = vsub.s32 4, %v2002_v47  ;;  %vm871_vm7 = vweird.f32 %v1859_v41 }
 0x1e2   :  { %v826_v14 = vadd.s32 %v825_v63, %v821_v2 }
 0x1e3   :  { %vm676_vm8 = vcmp.lt.s32.totalorder %v675_v6, 0  ;;  %v677_v0 = vsub.s32 0, %v675_v6 }
 0x1e4   :  { %v827_v53 = vadd.s32 536870912, %v826_v14 }
 0x1e5   :  { %v678_v9 = vsel %vm676_vm8, %v677_v0, %v675_v6  ;;  %v698_v0 = vsel %vm575_vm12, %v697_v38, %v2002_v47 }
 0x1e6   :  { %v2006_v25 = vshrl.u32 %v827_v53, 30  ;;  %v679_v56 = vclz %v678_v9  ;;  %v700_v42 = vsel %vm2012_vm13, 0, %v698_v0 }
 0x1e8   :  { %v829_v16 = vshll.u32 %v2006_v25, 30  ;;  %v1374_v3 = vadd.s32 4294967294, %v679_v56  ;;  %v852_v53 = vsub.s32 4, %v2006_v25 }
 0x1ea   :  { %v830_v51 = vsub.s32 %v826_v14, %v829_v16  ;;  %vm1375_vm9 = vcmp.lt.s32.totalorder %v1374_v3, 0 }
 0x1eb   :  { %v682_v15 = vsel %vm1375_vm9, 0, %v1374_v3 }
 0x1ec   :  { %vm831_vm10 = vcmp.lt.s32.totalorder %v830_v51, 0  ;;  %v832_v12 = vsub.s32 0, %v830_v51  ;;  %v683_v8 = vsub.s32 32, %v682_v15  ;;  %v687_v1 = vsub.s32 4294967266, %v682_v15 }
 0x1ed   :  { %v684_v29 = vshll.u32 %v675_v6, %v682_v15 }
 0x1ee   :  { %v833_v26 = vsel %vm831_vm10, %v832_v12, %v830_v51  ;;  %v685_v31 = vshrl.u32 %v667_v21, %v683_v8  ;;  %v688_v33 = vadd.s32 127, %v687_v1  ;;  %v853_v21 = vsel %vm730_vm14, %v852_v53, %v2006_v25 }
 0x1ef   :  { %v834_v4 = vclz %v833_v26 }
 0x1f0   :  { %v686_v35 = vor.u32 %v685_v31, %v684_v29  ;;  %v689_v27 = vshll.u32 %v688_v33, 23  ;;  %v717_v29 = vadd.s32 3, %v700_v42  ;;  %v855_v33 = vsel %vm2025_vm15, 0, %v853_v21 }
 0x1f1   :  { %v1377_v17 = vadd.s32 4294967294, %v834_v4 }
 0x1f2   :  { %v690_v23 = vor.u32 4788187, %v689_v27  ;;  %v693_v36 = vcvt.s32.f32 %v686_v35 }
 0x1f3   :  { %vm1378_vm11 = vcmp.lt.s32.totalorder %v1377_v17, 0 }
 0x1f4   :  { %v837_v52 = vsel %vm1378_vm11, 0, %v1377_v17  ;;  %v691_v45 = vand.u32 2147483647, %v690_v23 }
 0x1f5   :  { %v838_v48 = vsub.s32 32, %v837_v52  ;;  %v842_v19 = vsub.s32 4294967266, %v837_v52  ;;  %v839_v58 = vshll.u32 %v830_v51, %v837_v52  ;;  %v872_v52 = vadd.s32 3, %v855_v33 }
 0x1f6   :  { %v694_v44 = vmul.f32 %v693_v36, %v691_v45 }
 0x1f7   :  { %v840_v34 = vshrl.u32 %v822_v24, %v838_v48  ;;  %v843_v22 = vadd.s32 127, %v842_v19  ;;  %v718_v24 = vand.u32 3, %v717_v29 }
 0x1f8   :  { %v695_v55 = vxor.u32 2147483648, %v694_v44 }
 0x1f9   :  { %v841_v10 = vor.u32 %v840_v34, %v839_v58  ;;  %v844_v57 = vshll.u32 %v843_v22, 23  ;;  %vm720_vm0 = vcmp.eq.s32.totalorder %v718_v24, 0  ;;  %v873_v58 = vand.u32 3, %v872_v52 }
 0x1fa   :  { %v696_v59 = vsel %vm575_vm12, %v695_v55, %v694_v44  ;;  %vm723_vm1 = vcmp.eq.s32.totalorder %v718_v24, 2  ;;  %vm719_vm2 = vcmp.lt.s32.totalorder %v718_v24, 2 }
 0x1fb   :  { %v845_v7 = vor.u32 4788187, %v844_v57  ;;  %v699_v18 = vsel %vm2012_vm13, %v1853_v39, %v696_v59  ;;  %v848_v20 = vcvt.s32.f32 %v841_v10  ;;  %vm875_vm3 = vcmp.eq.s32.totalorder %v873_v58, 0 }
 0x1fc   :  { %v701_v60 = vmul.f32 %v699_v18, %v699_v18  ;;  %vm878_vm4 = vcmp.eq.s32.totalorder %v873_v58, 2  ;;  %vm874_vm5 = vcmp.lt.s32.totalorder %v873_v58, 2 }
 0x1fd   :  { %v846_v54 = vand.u32 2147483647, %v845_v7 }
 0x1fe   :  { %v702_v50 = vmul.f32 -0.001358992, %v701_v60  ;;  %v709_v28 = vmul.f32 -0.00019511016, %v701_v60 }
 0x1ff   :  { %v849_v61 = vmul.f32 %v848_v20, %v846_v54 }
 0x200   :  { %v703_v5 = vadd.f32 0.041655596, %v702_v50  ;;  %v710_v11 = vadd.f32 0.008332121, %v709_v28  ;;  %v1460_v50 = vld [vmem:[%s2196_s6] ss:$0 sm:$0xff] }
 0x201   :  { %v850_v2 = vxor.u32 2147483648, %v849_v61  ;;  %s1602_s6 = smov [#allocation10]  }
 0x202   :  { %v704_v13 = vmul.f32 %v703_v5, %v701_v60  ;;  %v711_v63 = vmul.f32 %v710_v11, %v701_v60  ;;  %s1282_s23 = sshll.u32 %s1602_s6, 4  ;;  %s1283_s23 = int_to_ptr.vmem [resolvable:$true] %s1282_s23 }
 0x203   :  { %v851_v14 = vsel %vm730_vm14, %v850_v2, %v849_v61 }
 0x204   :  { %v854_v9 = vsel %vm2025_vm15, %v1859_v41, %v851_v14  ;;  %v705_v56 = vadd.f32 -0.4999988, %v704_v13  ;;  %v712_v16 = vadd.f32 -0.16666654, %v711_v63 }
 0x205   :  { %v856_v3 = vmul.f32 %v854_v9, %v854_v9 }
 0x206   :  { %v713_v51 = vmul.f32 %v712_v16, %v701_v60  ;;  %v706_v8 = vmul.f32 %v705_v56, %v701_v60 }
 0x207   :  { %v857_v15 = vmul.f32 -0.001358992, %v856_v3  ;;  %v864_v12 = vmul.f32 -0.00019511016, %v856_v3 }
 0x208   :  { %v714_v1 = vadd.f32 1.0, %v713_v51  ;;  %v707_v27 = vadd.f32 1.0, %v706_v8 }
 0x209   :  { %v858_v47 = vadd.f32 0.041655596, %v857_v15  ;;  %v865_v26 = vadd.f32 0.008332121, %v864_v12 }
 0x20a   :  { %v715_v31 = vmul.f32 %v714_v1, %v699_v18  ;;  %v724_v25 = vxor.u32 2147483648, %v707_v27 }
 0x20b   :  { %v859_v4 = vmul.f32 %v858_v47, %v856_v3  ;;  %v866_v35 = vmul.f32 %v865_v26, %v856_v3 }
 0x20c   :  { %v721_v45 = vxor.u32 2147483648, %v715_v31  ;;  %v725_v10 = vsel %vm723_vm1, %v724_v25, %v715_v31 }
 0x20d   :  { %v860_v17 = vadd.f32 -0.4999988, %v859_v4  ;;  %v867_v23 = vadd.f32 -0.16666654, %v866_v35 }
 0x20e   :  { %v722_v34 = vsel %vm720_vm0, %v707_v27, %v721_v45 }
 0x20f   :  { %v861_v36 = vmul.f32 %v860_v17, %v856_v3  ;;  %v868_v48 = vmul.f32 %v867_v23, %v856_v3  ;;  %v726_v49 = vsel %vm719_vm2, %v722_v34, %v725_v10 }
 0x210   :  { %v727_v60 = vsel %vm716_vm6, nan, %v726_v49 }
 0x211   :  { %v862_v19 = vadd.f32 1.0, %v861_v36  ;;  %v869_v44 = vadd.f32 1.0, %v868_v48 }
 0x213   :  { %v870_v22 = vmul.f32 %v869_v44, %v854_v9  ;;  %v879_v55 = vxor.u32 2147483648, %v862_v19 }
 0x215   :  { %v876_v57 = vxor.u32 2147483648, %v870_v22  ;;  %v880_v7 = vsel %vm878_vm4, %v879_v55, %v870_v22 }
 0x217   :  { %v877_v59 = vsel %vm875_vm3, %v862_v19, %v876_v57 }
 0x218   :  { %v881_v18 = vsel %vm874_vm5, %v877_v59, %v880_v7 }
 0x219   :  { %v882_v54 = vsel %vm871_vm7, nan, %v881_v18 }
 0x21a   :  { %v883_v20 = vpack.c.bf16 %v882_v54, %v727_v60 }
 0x21c   :  { %960 = vmatmul.bf16.vlgmr.msra.gmra.mxu2 %v883_v20 }
 0x29f   :  { %v961_v28 = vpop.f32.mrf.mxu2 }
 0x2a0   :  { %v2046_v61 = vadd.f32 %v1460_v50, %v961_v28 }
 0x2a2   :  { %v966_v38 = vand.u32 2147483647, %v2046_v61  ;;  %v969_v5 = vand.u32 2139095040, %v2046_v61 }
 0x2a4   :  { %v970_v11 = vshrl.u32 %v969_v5, 23  ;;  %v973_v39 = vand.u32 8388607, %v966_v38 }
 0x2a6   :  { %v1411_v41 = vadd.s32 4294967169, %v970_v11  ;;  %v974_v2 = vor.u32 8388608, %v973_v39 }
 0x2a7   :  { %v963_v13 = vpop.f32.mrf.mxu2 }
 0x2a8   :  { %v976_v63 = vadd.s32 1, %v1411_v41  ;;  %v2052_v6 = vadd.f32 %v1460_v50, %v963_v13  ;;  %v2054_v14 = vshll.u32 %v974_v2, 8 }
 0x2aa   :  { %vm977_vm8 = vcmp.gt.s32.totalorder %v976_v63, 0  ;;  %v1121_v53 = vand.u32 2147483647, %v2052_v6  ;;  %v1124_v9 = vand.u32 2139095040, %v2052_v6  ;;  %v1015_v3 = vand.u32 65535, %v2054_v14 }
 0x2ab   :  { %v978_v0 = vsel %vm977_vm8, %v976_v63, 0  ;;  %v1016_v42 = vshrl.u32 %v2054_v14, 16 }
 0x2ac   :  { %v980_v56 = vand.u32 31, %v978_v0  ;;  %v1125_v51 = vshrl.u32 %v1124_v9, 23  ;;  %v979_v15 = vshrl.u32 %v978_v0, 5  ;;  %v2064_v8 = vand.u32 8388607, %v1121_v53 }
 0x2ae   :  { %v981_v16 = vsub.s32 32, %v980_v56  ;;  %v983_v12 = vshll.u32 %v1595_v30, %v980_v56  ;;  %v986_v21 = vshll.u32 %v1596_v32, %v980_v56  ;;  %v989_v26 = vshll.u32 %v1597_v37, %v980_v56 }
 0x2af   :  { %v992_v31 = vshll.u32 %v1598_v40, %v980_v56  ;;  %v995_v4 = vshll.u32 %v1599_v43, %v980_v56  ;;  %v1414_v24 = vadd.s32 4294967169, %v1125_v51  ;;  %vm998_vm9 = vcmp.lt.s32.totalorder %v979_v15, 1 }
 0x2b0   :  { %v984_v1 = vshrl.u32 %v1596_v32, %v981_v16  ;;  %v987_v47 = vshrl.u32 %v1597_v37, %v981_v16  ;;  %v990_v29 = vshrl.u32 %v1598_v40, %v981_v16  ;;  %v993_v33 = vshrl.u32 %v1599_v43, %v981_v16 }
 0x2b1   :  { %v996_v35 = vshrl.u32 %v1600_v46, %v981_v16  ;;  %vm1001_vm10 = vcmp.lt.s32.totalorder %v979_v15, 4  ;;  %v982_v36 = vshrl.u32 %v1595_v30, %v981_v16  ;;  %vm1000_vm11 = vcmp.lt.s32.totalorder %v979_v15, 3 }
 0x2b2   :  { %v985_v27 = vor.u32 %v984_v1, %v983_v12  ;;  %v988_v17 = vor.u32 %v987_v47, %v986_v21  ;;  %v991_v23 = vor.u32 %v990_v29, %v989_v26  ;;  %v994_v52 = vor.u32 %v993_v33, %v992_v31 }
 0x2b3   :  { %v997_v45 = vor.u32 %v996_v35, %v995_v4  ;;  %v1131_v34 = vadd.s32 1, %v1414_v24  ;;  %vm999_vm12 = vcmp.lt.s32.totalorder %v979_v15, 2  ;;  %v1129_v20 = vor.u32 8388608, %v2064_v8 }
 0x2b4   :  { %v1003_v48 = vsel %vm1001_vm10, %v991_v23, 2102212464  ;;  %v1006_v25 = vsel %vm998_vm9, %v985_v27, %v988_v17  ;;  %v1010_v19 = vsel %vm998_vm9, %v988_v17, %v991_v23  ;;  %v1007_v44 = vsel %vm1001_vm10, %v994_v52, 920167782 }
 0x2b5   :  { %v1011_v58 = vsel %vm1001_vm10, %v997_v45, 1326507024  ;;  %v1002_v22 = vsel %vm998_vm9, %v982_v36, %v985_v27  ;;  %v1008_v55 = vsel %vm1000_vm11, %v991_v23, %v1007_v44  ;;  %v1004_v57 = vsel %vm1000_vm11, %v988_v17, %v1003_v48 }
 0x2b6   :  { %v1012_v10 = vsel %vm1000_vm11, %v994_v52, %v1011_v58  ;;  %v1009_v49 = vsel %vm999_vm12, %v1006_v25, %v1008_v55  ;;  %vm1132_vm13 = vcmp.gt.s32.totalorder %v1131_v34, 0  ;;  %v2076_v50 = vsel %vm999_vm12, %v1002_v22, %v1004_v57 }
 0x2b7   :  { %v1013_v59 = vsel %vm999_vm12, %v1010_v19, %v1012_v10  ;;  %v1039_v60 = vand.u32 65535, %v1009_v49  ;;  %v1040_v54 = vshrl.u32 %v1009_v49, 16  ;;  %v1133_v11 = vsel %vm1132_vm13, %v1131_v34, 0 }
 0x2b8   :  { %v1017_v7 = vand.u32 65535, %v1013_v59  ;;  %v1018_v18 = vshrl.u32 %v1013_v59, 16  ;;  %v1135_v1 = vand.u32 31, %v1133_v11  ;;  %v2083_v35 = vshrl.u32 %v1133_v11, 5 }
 0x2b9   :  { %v1042_v2 = vmul.u32 %v1040_v54, %v1015_v3  ;;  %v1043_v13 = vmul.u32 %v1039_v60, %v1016_v42  ;;  %v1041_v9 = vmul.u32 %v1039_v60, %v1015_v3  ;;  %v1044_v56 = vmul.u32 %v1040_v54, %v1016_v42 }
 0x2ba   :  { %v1020_v28 = vmul.u32 %v1018_v18, %v1015_v3  ;;  %v1021_v5 = vmul.u32 %v1017_v7, %v1016_v42  ;;  %v1019_v39 = vmul.u32 %v1017_v7, %v1015_v3  ;;  %v1022_v41 = vmul.u32 %v1018_v18, %v1016_v42 }
 0x2bb   :  { %v1045_v15 = vshll.u32 %v1042_v2, 16  ;;  %v1046_v12 = vshrl.u32 %v1042_v2, 16  ;;  %v1047_v8 = vshll.u32 %v1043_v13, 16  ;;  %v1048_v26 = vshrl.u32 %v1043_v13, 16 }
 0x2bc   :  { %v1023_v63 = vshll.u32 %v1020_v28, 16  ;;  %v1024_v0 = vshrl.u32 %v1020_v28, 16  ;;  %v1025_v16 = vshll.u32 %v1021_v5, 16  ;;  %v1026_v51 = vshrl.u32 %v1021_v5, 16 }
 0x2bd   :  { %vm1049_vm15 = vc.u32 %v1041_v9, %v1045_v15  ;;  %v1051_v29 = vadd.s32 %v1045_v15, %v1041_v9  ;;  %v2080_v4 = vsub.s32 32, %v1135_v1  ;;  %v1138_v24 = vshll.u32 %v1595_v30, %v1135_v1 }
 0x2be   :  { %vm1027_vm14 = vc.u32 %v1019_v39, %v1023_v63  ;;  %v1029_v21 = vadd.s32 %v1023_v63, %v1019_v39  ;;  %v1050_v33 = vsel %vm1049_vm15, 1, %v1601_v62  ;;  %v1141_v36 = vshll.u32 %v1596_v32, %v1135_v1 }
 0x2bf   :  { %v1028_v47 = vsel %vm1027_vm14, 1, %v1601_v62  ;;  %v1052_v42 = vadd.s32 %v1050_v33, %v1044_v56  ;;  %vm1053_vm1 = vc.u32 %v1051_v29, %v1047_v8  ;;  %v2086_v23 = vadd.s32 %v1051_v29, %v1047_v8 }
 0x2c0   :  { %v1030_v31 = vadd.s32 %v1028_v47, %v1022_v41  ;;  %vm1031_vm0 = vc.u32 %v1029_v21, %v1025_v16  ;;  %v1054_v17 = vsel %vm1053_vm1, 1, %v1601_v62  ;;  %v1139_v45 = vshrl.u32 %v1596_v32, %v2080_v4 }
 0x2c1   :  { %v1032_v3 = vsel %vm1031_vm0, 1, %v1601_v62  ;;  %v1056_v52 = vadd.s32 %v1054_v17, %v1052_v42  ;;  %v1142_v48 = vshrl.u32 %v1597_v37, %v2080_v4  ;;  %v1144_v19 = vshll.u32 %v1597_v37, %v1135_v1 }
 0x2c2   :  { %v1034_v27 = vadd.s32 %v1032_v3, %v1030_v31  ;;  %v1145_v44 = vshrl.u32 %v1598_v40, %v2080_v4  ;;  %v1147_v58 = vshll.u32 %v1598_v40, %v1135_v1  ;;  %v2098_v22 = vor.u32 %v1139_v45, %v1138_v24 }
 0x2c3   :  { %v1057_v34 = vadd.s32 %v1056_v52, %v1046_v12  ;;  %v2100_v55 = vor.u32 %v1142_v48, %v1141_v36  ;;  %v1148_v10 = vshrl.u32 %v1599_v43, %v2080_v4  ;;  %v1150_v49 = vshll.u32 %v1599_v43, %v1135_v1 }
 0x2c4   :  { %v1035_v25 = vadd.s32 %v1034_v27, %v1024_v0  ;;  %v1146_v57 = vor.u32 %v1145_v44, %v1144_v19  ;;  %v1151_v37 = vshrl.u32 %v1600_v46, %v2080_v4  ;;  %vm1153_vm3 = vcmp.lt.s32.totalorder %v2083_v35, 1 }
 0x2c5   :  { %v1058_v59 = vadd.s32 %v1057_v34, %v1048_v26  ;;  %v1149_v7 = vor.u32 %v1148_v10, %v1147_v58  ;;  %v2112_v18 = vshll.u32 %v1129_v20, 8  ;;  %v1059_v60 = vmul.u32 %v2054_v14, %v2076_v50 }
 0x2c6   :  { %v2104_v32 = vadd.s32 %v1035_v25, %v1026_v51  ;;  %v1152_v40 = vor.u32 %v1151_v37, %v1150_v49  ;;  %vm1156_vm4 = vcmp.lt.s32.totalorder %v2083_v35, 4  ;;  %v1161_v43 = vsel %vm1153_vm3, %v2098_v22, %v2100_v55 }
 0x2c7   :  { %v1062_v54 = vadd.s32 1, %v1058_v59  ;;  %vm1155_vm5 = vcmp.lt.s32.totalorder %v2083_v35, 3  ;;  %v1162_v46 = vsel %vm1156_vm4, %v1149_v7, 920167782  ;;  %v1165_v20 = vsel %vm1153_vm3, %v2100_v55, %v1146_v57 }
 0x2c8   :  { %vm1061_vm2 = vc.u32 %v2104_v32, %v2086_v23  ;;  %v1166_v14 = vsel %vm1156_vm4, %v1152_v40, 1326507024  ;;  %vm1154_vm6 = vcmp.lt.s32.totalorder %v2083_v35, 2  ;;  %v1163_v28 = vsel %vm1155_vm5, %v1146_v57, %v1162_v46 }
 0x2c9   :  { %v1063_v50 = vsel %vm1061_vm2, %v1062_v54, %v1058_v59  ;;  %v1167_v5 = vsel %vm1155_vm5, %v1149_v7, %v1166_v14  ;;  %v1164_v39 = vsel %vm1154_vm6, %v1161_v43, %v1163_v28  ;;  %v1170_v2 = vand.u32 65535, %v2112_v18 }
 0x2ca   :  { %v1064_v11 = vadd.s32 %v1063_v50, %v1059_v60  ;;  %v1168_v41 = vsel %vm1154_vm6, %v1165_v20, %v1167_v5  ;;  %v1171_v13 = vshrl.u32 %v2112_v18, 16  ;;  %v1195_v9 = vshrl.u32 %v1164_v39, 16 }
 0x2cb   :  { %v1172_v63 = vand.u32 65535, %v1168_v41  ;;  %v1173_v0 = vshrl.u32 %v1168_v41, 16  ;;  %v1194_v16 = vand.u32 65535, %v1164_v39  ;;  %v1158_v37 = vsel %vm1156_vm4, %v1146_v57, 2102212464 }
 0x2cc   :  { %v1065_v56 = vadd.s32 536870912, %v1064_v11  ;;  %v1197_v21 = vmul.u32 %v1195_v9, %v1170_v2  ;;  %v1199_v48 = vmul.u32 %v1195_v9, %v1171_v13  ;;  %v1137_v7 = vshrl.u32 %v1595_v30, %v2080_v4 }
 0x2cd   :  { %v1175_v51 = vmul.u32 %v1173_v0, %v1170_v2  ;;  %v1176_v15 = vmul.u32 %v1172_v63, %v1171_v13  ;;  %v1174_v8 = vmul.u32 %v1172_v63, %v1170_v2  ;;  %v1177_v26 = vmul.u32 %v1173_v0, %v1171_v13 }
 0x2ce   :  { %v2140_v12 = vshrl.u32 %v1065_v56, 30  ;;  %v1196_v29 = vmul.u32 %v1194_v16, %v1170_v2  ;;  %v1200_v31 = vshll.u32 %v1197_v21, 16  ;;  %v1198_v42 = vmul.u32 %v1194_v16, %v1171_v13 }
 0x2cf   :  { %v1178_v1 = vshll.u32 %v1175_v51, 16  ;;  %v1180_v33 = vshll.u32 %v1176_v15, 16  ;;  %v1179_v24 = vshrl.u32 %v1175_v51, 16  ;;  %v1181_v40 = vshrl.u32 %v1176_v15, 16 }
 0x2d0   :  { %v1067_v47 = vshll.u32 %v2140_v12, 30  ;;  %vm1204_vm9 = vc.u32 %v1196_v29, %v1200_v31  ;;  %v1202_v19 = vshll.u32 %v1198_v42, 16  ;;  %v1206_v58 = vadd.s32 %v1200_v31, %v1196_v29 }
 0x2d1   :  { %vm1182_vm7 = vc.u32 %v1174_v8, %v1178_v1  ;;  %v1184_v3 = vadd.s32 %v1178_v1, %v1174_v8  ;;  %v1205_v44 = vsel %vm1204_vm9, 1, %v1601_v62  ;;  %v1201_v43 = vshrl.u32 %v1197_v21, 16 }
 0x2d2   :  { %v1068_v27 = vsub.s32 %v1064_v11, %v1067_v47  ;;  %v1183_v17 = vsel %vm1182_vm7, 1, %v1601_v62  ;;  %v1207_v10 = vadd.s32 %v1205_v44, %v1199_v48  ;;  %vm1208_vm11 = vc.u32 %v1206_v58, %v1202_v19 }
 0x2d3   :  { %v1185_v52 = vadd.s32 %v1183_v17, %v1177_v26  ;;  %vm1186_vm8 = vc.u32 %v1184_v3, %v1180_v33  ;;  %v1209_v60 = vsel %vm1208_vm11, 1, %v1601_v62  ;;  %v1157_v20 = vsel %vm1153_vm3, %v1137_v7, %v2098_v22 }
 0x2d4   :  { %vm1069_vm10 = vcmp.lt.s32.totalorder %v1068_v27, 0  ;;  %v1070_v45 = vsub.s32 0, %v1068_v27  ;;  %v1187_v36 = vsel %vm1186_vm8, 1, %v1601_v62  ;;  %v1211_v46 = vadd.s32 %v1209_v60, %v1207_v10 }
 0x2d5   :  { %v1189_v25 = vadd.s32 %v1187_v36, %v1185_v52  ;;  %v1159_v14 = vsel %vm1155_vm5, %v2100_v55, %v1158_v37  ;;  %v1203_v50 = vshrl.u32 %v1198_v42, 16  ;;  %v1060_v30 = vadd.s32 %v2086_v23, %v2104_v32 }
 0x2d6   :  { %v1071_v34 = vsel %vm1069_vm10, %v1070_v45, %v1068_v27  ;;  %v1212_v28 = vadd.s32 %v1211_v46, %v1201_v43  ;;  %v1210_v62 = vadd.s32 %v1206_v58, %v1202_v19  ;;  %v1160_v39 = vsel %vm1154_vm6, %v1157_v20, %v1159_v14 }
 0x2d7   :  { %v1072_v49 = vclz %v1071_v34  ;;  %v1190_v59 = vadd.s32 %v1189_v25, %v1179_v24  ;;  %v1214_v63 = vmul.u32 %v2112_v18, %v1160_v39  ;;  %vm968_vm14 = vcmp.lt.s32.totalorder %v2046_v61, 0 }
 0x2d8   :  { %v1213_v41 = vadd.s32 %v1212_v28, %v1203_v50  ;;  %vm2168_vm15 = vcmp.le.f32.partialorder %v966_v38, 0.7853982  ;;  %v1090_v29 = vsub.s32 4, %v2140_v12  ;;  %vm1109_vm5 = vweird.f32 %v2046_v61 }
 0x2d9   :  { %v1412_v54 = vadd.s32 4294967294, %v1072_v49  ;;  %v1191_v57 = vadd.s32 %v1190_v59, %v1181_v40  ;;  %vm1123_vm6 = vcmp.lt.s32.totalorder %v2052_v6, 0  ;;  %vm1122_vm7 = vcmp.le.f32.partialorder %v1121_v53, 0.7853982 }
 0x2da   :  { %v1217_v55 = vadd.s32 1, %v1213_v41  ;;  %v1091_v52 = vsel %vm968_vm14, %v1090_v29, %v2140_v12  ;;  %vm1264_vm11 = vweird.f32 %v2052_v6 }
 0x2db   :  { %vm1413_vm12 = vcmp.lt.s32.totalorder %v1412_v54, 0  ;;  %vm1216_vm13 = vc.u32 %v1191_v57, %v1210_v62  ;;  %v1093_v48 = vsel %vm2168_vm15, 0, %v1091_v52  ;;  %v1215_v34 = vadd.s32 %v1210_v62, %v1191_v57 }
 0x2dc   :  { %v1075_v4 = vsel %vm1413_vm12, 0, %v1412_v54  ;;  %v1218_v56 = vsel %vm1216_vm13, %v1217_v55, %v1213_v41  ;;  %v1110_v37 = vadd.s32 3, %v1093_v48 }
 0x2dd   :  { %v1076_v5 = vsub.s32 32, %v1075_v4  ;;  %v1080_v11 = vsub.s32 4294967266, %v1075_v4  ;;  %v1077_v22 = vshll.u32 %v1068_v27, %v1075_v4  ;;  %v1219_v16 = vadd.s32 %v1218_v56, %v1214_v63 }
 0x2de   :  { %v1111_v14 = vand.u32 3, %v1110_v37 }
 0x2df   :  { %v1078_v2 = vshrl.u32 %v1060_v30, %v1076_v5  ;;  %v1081_v13 = vadd.s32 127, %v1080_v11  ;;  %v1220_v32 = vadd.s32 536870912, %v1219_v16 }
 0x2e0   :  { %vm1113_vm2 = vcmp.eq.s32.totalorder %v1111_v14, 0  ;;  %vm1116_vm3 = vcmp.eq.s32.totalorder %v1111_v14, 2  ;;  %vm1112_vm4 = vcmp.lt.s32.totalorder %v1111_v14, 2 }
 0x2e1   :  { %v1079_v0 = vor.u32 %v1078_v2, %v1077_v22  ;;  %v1082_v9 = vshll.u32 %v1081_v13, 23  ;;  %v2162_v21 = vshrl.u32 %v1220_v32, 30 }
 0x2e3   :  { %v1083_v23 = vor.u32 4788187, %v1082_v9  ;;  %v1086_v15 = vcvt.s32.f32 %v1079_v0  ;;  %v1222_v8 = vshll.u32 %v2162_v21, 30  ;;  %v1245_v63 = vsub.s32 4, %v2162_v21 }
 0x2e5   :  { %v1084_v51 = vand.u32 2147483647, %v1083_v23  ;;  %v1223_v47 = vsub.s32 %v1219_v16, %v1222_v8  ;;  %v1246_v23 = vsel %vm1123_vm6, %v1245_v63, %v2162_v21 }
 0x2e7   :  { %v1087_v35 = vmul.f32 %v1086_v15, %v1084_v51  ;;  %vm1224_vm0 = vcmp.lt.s32.totalorder %v1223_v47, 0  ;;  %v1225_v33 = vsub.s32 0, %v1223_v47  ;;  %v1248_v51 = vsel %vm1122_vm7, 0, %v1246_v23 }
 0x2e9   :  { %v1088_v1 = vxor.u32 2147483648, %v1087_v35  ;;  %v1226_v42 = vsel %vm1224_vm0, %v1225_v33, %v1223_v47 }
 0x2ea   :  { %v1227_v17 = vclz %v1226_v42 }
 0x2eb   :  { %v1089_v26 = vsel %vm968_vm14, %v1088_v1, %v1087_v35 }
 0x2ec   :  { %v1092_v31 = vsel %vm2168_vm15, %v2046_v61, %v1089_v26  ;;  %v1415_v45 = vadd.s32 4294967294, %v1227_v17 }
 0x2ed   :  { %v1094_v3 = vmul.f32 %v1092_v31, %v1092_v31 }
 0x2ee   :  { %vm1416_vm1 = vcmp.lt.s32.totalorder %v1415_v45, 0 }
 0x2ef   :  { %v1102_v27 = vmul.f32 -0.00019511016, %v1094_v3  ;;  %v1095_v24 = vmul.f32 -0.001358992, %v1094_v3  ;;  %v1230_v44 = vsel %vm1416_vm1, 0, %v1415_v45 }
 0x2f0   :  { %v1231_v10 = vsub.s32 32, %v1230_v44  ;;  %v1235_v49 = vsub.s32 4294967266, %v1230_v44  ;;  %v1232_v40 = vshll.u32 %v1223_v47, %v1230_v44  ;;  %v1265_v47 = vadd.s32 3, %v1248_v51 }
 0x2f1   :  { %v1103_v38 = vadd.f32 0.008332121, %v1102_v27  ;;  %v1096_v36 = vadd.f32 0.041655596, %v1095_v24 }
 0x2f2   :  { %v1233_v60 = vshrl.u32 %v1215_v34, %v1231_v10  ;;  %v1236_v12 = vadd.s32 127, %v1235_v49 }
 0x2f3   :  { %v1104_v25 = vmul.f32 %v1103_v38, %v1094_v3  ;;  %v1097_v19 = vmul.f32 %v1096_v36, %v1094_v3 }
 0x2f4   :  { %v1234_v46 = vor.u32 %v1233_v60, %v1232_v40  ;;  %v1237_v20 = vshll.u32 %v1236_v12, 23 }
 0x2f5   :  { %v1105_v58 = vadd.f32 -0.16666654, %v1104_v25  ;;  %v1098_v59 = vadd.f32 -0.4999988, %v1097_v19 }
 0x2f6   :  { %v1238_v30 = vor.u32 4788187, %v1237_v20  ;;  %v1241_v57 = vcvt.s32.f32 %v1234_v46 }
 0x2f7   :  { %v1106_v7 = vmul.f32 %v1105_v58, %v1094_v3  ;;  %v1099_v54 = vmul.f32 %v1098_v59, %v1094_v3 }
 0x2f8   :  { %v1239_v11 = vand.u32 2147483647, %v1238_v30 }
 0x2f9   :  { %v1107_v43 = vadd.f32 1.0, %v1106_v7  ;;  %v1100_v50 = vadd.f32 1.0, %v1099_v54 }
 0x2fa   :  { %v1242_v62 = vmul.f32 %v1241_v57, %v1239_v11 }
 0x2fb   :  { %v1108_v28 = vmul.f32 %v1107_v43, %v1092_v31  ;;  %v1117_v4 = vxor.u32 2147483648, %v1100_v50  ;;  %v1266_v31 = vand.u32 3, %v1265_v47 }
 0x2fc   :  { %v1243_v2 = vxor.u32 2147483648, %v1242_v62 }
 0x2fd   :  { %v1114_v5 = vxor.u32 2147483648, %v1108_v28  ;;  %v1118_v41 = vsel %vm1116_vm3, %v1117_v4, %v1108_v28  ;;  %vm1268_vm8 = vcmp.eq.s32.totalorder %v1266_v31, 0  ;;  %vm1271_vm9 = vcmp.eq.s32.totalorder %v1266_v31, 2 }
 0x2fe   :  { %v1244_v55 = vsel %vm1123_vm6, %v1243_v2, %v1242_v62  ;;  %vm1267_vm10 = vcmp.lt.s32.totalorder %v1266_v31, 2 }
 0x2ff   :  { %v1115_v39 = vsel %vm1113_vm2, %v1100_v50, %v1114_v5  ;;  %v1247_v0 = vsel %vm1122_vm7, %v2052_v6, %v1244_v55 }
 0x300   :  { %v1119_v22 = vsel %vm1112_vm4, %v1115_v39, %v1118_v41  ;;  %v1249_v9 = vmul.f32 %v1247_v0, %v1247_v0 }
 0x301   :  { %v1120_v13 = vsel %vm1109_vm5, nan, %v1119_v22 }
 0x302   :  { %1276 = vst [vmem:[#allocation10] sm:$0xff] %v1120_v13  ;;  %v1257_v56 = vmul.f32 -0.00019511016, %v1249_v9  ;;  %v1250_v16 = vmul.f32 -0.001358992, %v1249_v9 }
 0x304   :  { %v1258_v61 = vadd.f32 0.008332121, %v1257_v56  ;;  %v1251_v32 = vadd.f32 0.041655596, %v1250_v16 }
 0x306   :  { %v1259_v15 = vmul.f32 %v1258_v61, %v1249_v9  ;;  %v1252_v35 = vmul.f32 %v1251_v32, %v1249_v9 }
 0x308   :  { %v1260_v8 = vadd.f32 -0.16666654, %v1259_v15  ;;  %v1253_v1 = vadd.f32 -0.4999988, %v1252_v35 }
 0x30a   :  { %v1261_v18 = vmul.f32 %v1260_v8, %v1249_v9  ;;  %v1254_v53 = vmul.f32 %v1253_v1, %v1249_v9 }
 0x30c   :  { %v1262_v26 = vadd.f32 1.0, %v1261_v18  ;;  %v1255_v29 = vadd.f32 1.0, %v1254_v53 }
 0x30e   :  { %v1263_v33 = vmul.f32 %v1262_v26, %v1247_v0  ;;  %v1272_v3 = vxor.u32 2147483648, %v1255_v29 }
 0x310   :  { %v1269_v21 = vxor.u32 2147483648, %v1263_v33  ;;  %v1273_v27 = vsel %vm1271_vm9, %v1272_v3, %v1263_v33 }
 0x312   :  { %v1270_v42 = vsel %vm1268_vm8, %v1255_v29, %v1269_v21 }
 0x313   :  { %v1274_v17 = vsel %vm1267_vm10, %v1270_v42, %v1273_v27 }
 0x314   :  { %v1275_v24 = vsel %vm1264_vm11, nan, %v1274_v17 }
 0x315   :  { %1277 = vst [vmem:[#allocation10 + $0x8] sm:$0xff] %v1275_v24 }
 0x316   :  { %1290 = dma.vmem_to_hbm [thread:$0]  %s1283_s23, 256, %s1285_s26, [#allocation4], %s1603_s27, %s1603_s27, %s1604_s28  }
 0x317   :  { %1587 = dma.done.wait [#allocation4], 256  }
 0x318   :  { %1588 = vsyncadd [#allocation4], 4294967040 }
 0x319   :  { %1295 = vsyncpa [#allocation3], 1 }
 0x31a   :  { %1296 = vsyncpa [#allocation6], 1 }
 0x31b   :  { %1297 = vsyncpa [#allocation9], 1 }
 0x31c   :  { %1298 = vsyncpa [#allocation4], 1 }

</bundles_post_ra>
